<compile_context>
chip_gen: v5e
topology: v5e:2x2
jax: 0.10.0
libtpu: 0.0.40
codegen_flags: <defaults>
</compile_context>

<pallas_src>
import jax
import jax.numpy as jnp
from jax.experimental import pallas as pl
from jax.experimental.pallas import tpu as pltpu


def _timestep_encoder_kernel(t_ref, w_ref, b_ref, out_ref):
    # t_ref: (bt, 1), w_ref: (1, H), b_ref: (1, H), out_ref: (bt, H)
    t = t_ref[...].astype(jnp.float32)        # (bt, 1)
    w = w_ref[...]                            # (1, H)  float32
    b = b_ref[...]                            # (1, H)  float32 (+pi/2 phase on cos half)
    # Single full-width transcendental; broadcast multiply stays on the VPU/XLU.
    # Compute in f32 (v5e has no bf16 VPU/EUP); cast only at the store.
    out_ref[...] = jnp.sin(t * w + b).astype(out_ref.dtype)


def _pick_block_rows(B, block_rows):
    """Batch tile: as large as useful, multiple of 8 sublanes, >=2 grid steps when B > 8."""
    if B <= 8:
        return B                      # single block equal to the full array (legal)
    half = -(-B // 2)                 # cdiv(B, 2): guarantee >= 2 grid steps (v7x 2 TCs)
    half = -(-half // 8) * 8          # round up to a multiple of 8 sublanes
    bt = min(block_rows, half)
    bt = max(8, (bt // 8) * 8)
    return bt


def timestep_encoder_forward(t, weight, bias, *, block_rows=2048, out_dtype=None):
    """t: (B, 1); weight: (1, H/2); bias: (H/2,). Returns (B, H) = [sin(proj), cos(proj)]."""
    B = t.shape[0]
    half = weight.shape[1]
    H = 2 * half
    out_dtype = t.dtype if out_dtype is None else jnp.dtype(out_dtype)

    # Fold the [sin, cos] concat into one sin via cos(x) = sin(x + pi/2).
    w_full = jnp.concatenate([weight, weight], axis=-1).reshape(1, H).astype(jnp.float32)
    b_phase = jnp.concatenate(
        [bias, bias + jnp.float32(jnp.pi / 2)], axis=-1
    ).reshape(1, H).astype(jnp.float32)
    t32 = t.reshape(B, 1).astype(jnp.float32)

    bt = _pick_block_rows(B, block_rows)
    grid = (pl.cdiv(B, bt),)          # ragged last block handled by Pallas (masked stores)

    out_bytes = jnp.dtype(out_dtype).itemsize
    cost = pl.CostEstimate(
        flops=2 * B * H,
        transcendentals=B * H,
        bytes_accessed=B * 4 + 2 * H * 4 + B * H * out_bytes,
    )

    return pl.pallas_call(
        _timestep_encoder_kernel,
        out_shape=jax.ShapeDtypeStruct((B, H), out_dtype),
        grid_spec=pl.GridSpec(
            grid=grid,
            in_specs=[
                pl.BlockSpec((bt, 1), lambda i: (i, 0)),   # t tile (pipelined)
                pl.BlockSpec((1, H), lambda i: (0, 0)),    # w_full resident across grid
                pl.BlockSpec((1, H), lambda i: (0, 0)),    # b_phase resident across grid
            ],
            out_specs=pl.BlockSpec((bt, H), lambda i: (i, 0)),
        ),
        compiler_params=pltpu.CompilerParams(
            dimension_semantics=("parallel",),
        ),
        cost_estimate=cost,
    )(t32, w_full, b_phase)


def reference_forward(t, weight, bias):
    proj = t.astype(jnp.float32) @ weight + bias[None, :]
    return jnp.concatenate([jnp.sin(proj), jnp.cos(proj)], axis=-1)


if __name__ == "__main__":
    key = jax.random.PRNGKey(0)
    k_t, k_w, k_b = jax.random.split(key, 3)

    hidden_dim = 256          # ConditionalMaskGenerator default -> lane-dense (256) output
    half = hidden_dim // 2

    # PyTorch Linear(1, half) default init: U(-1/sqrt(in), 1/sqrt(in)), in_features = 1.
    weight = jax.random.uniform(k_w, (1, half), jnp.float32, minval=-1.0, maxval=1.0)
    bias = jax.random.uniform(k_b, (half,), jnp.float32, minval=-1.0, maxval=1.0)

    # Case 1: divisible batch -> 2-step "parallel" grid (bt = B/2 = 32).
    t = jax.random.uniform(k_t, (64, 1), jnp.float32, minval=0.0, maxval=10.0)
    out = jax.block_until_ready(timestep_encoder_forward(t, weight, bias))
    ref = reference_forward(t, weight, bias)
    assert out.shape == (64, hidden_dim), out.shape
    assert jnp.allclose(out, ref, atol=1e-5, rtol=1e-5), "mismatch vs reference (f32)"

    # Case 2: ragged batch (B % bt != 0) -> no pad / out[:B] copy; Pallas masks last block.
    t2 = jax.random.uniform(k_t, (50, 1), jnp.float32, minval=0.0, maxval=10.0)
    out2 = jax.block_until_ready(timestep_encoder_forward(t2, weight, bias))
    ref2 = reference_forward(t2, weight, bias)
    assert out2.shape == (50, hidden_dim), out2.shape
    assert jnp.allclose(out2, ref2, atol=1e-5, rtol=1e-5), "mismatch vs reference (ragged)"

    # Case 3: bf16 output store (halves HBM writeback); compute stays f32.
    out3 = jax.block_until_ready(
        timestep_encoder_forward(t, weight, bias, out_dtype=jnp.bfloat16)
    )
    assert out3.dtype == jnp.bfloat16
    assert jnp.allclose(out3.astype(jnp.float32), ref, atol=2e-2, rtol=2e-2), \
        "mismatch vs reference (bf16 store)"

    print("KERNEL_OK")
</pallas_src>

<mosaic_0001>
module attributes {stable_mosaic.version = 11 : i64} {
  func.func @_timestep_encoder_kernel(%arg0: i32, %arg1: memref<32x1xf32, #tpu.memory_space<vmem>>, %arg2: memref<1x256xf32, #tpu.memory_space<vmem>>, %arg3: memref<1x256xf32, #tpu.memory_space<vmem>>, %arg4: memref<32x256xf32, #tpu.memory_space<vmem>>) attributes {dimension_semantics = [#tpu.dimension_semantics<parallel>], iteration_bounds = array<i64: 2>, scalar_prefetch = 0 : i64, scratch_operands = 0 : i64, tpu.core_type = #tpu.core_type<tc>, window_params = [{transform_indices = @transform_0, window_bounds = array<i64: 32, 1>}, {pipeline_mode = #tpu.pipeline_mode<synchronous>, transform_indices = @transform_1, window_bounds = array<i64: 1, 256>}, {pipeline_mode = #tpu.pipeline_mode<synchronous>, transform_indices = @transform_2, window_bounds = array<i64: 1, 256>}, {transform_indices = @transform_3, window_bounds = array<i64: 32, 256>}]} {
    %c0 = arith.constant 0 : index
    %c0_0 = arith.constant 0 : index
    %0 = vector.load %arg1[%c0, %c0_0] : memref<32x1xf32, #tpu.memory_space<vmem>>, vector<32x1xf32>
    %c0_1 = arith.constant 0 : index
    %c0_2 = arith.constant 0 : index
    %1 = vector.load %arg2[%c0_1, %c0_2] : memref<1x256xf32, #tpu.memory_space<vmem>>, vector<1x256xf32>
    %c0_3 = arith.constant 0 : index
    %c0_4 = arith.constant 0 : index
    %2 = vector.load %arg3[%c0_3, %c0_4] : memref<1x256xf32, #tpu.memory_space<vmem>>, vector<1x256xf32>
    %3 = vector.broadcast %0 : vector<32x1xf32> to vector<32x256xf32>
    %4 = vector.broadcast %1 : vector<1x256xf32> to vector<32x256xf32>
    %5 = arith.mulf %3, %4 : vector<32x256xf32>
    %6 = vector.broadcast %2 : vector<1x256xf32> to vector<32x256xf32>
    %7 = arith.addf %5, %6 : vector<32x256xf32>
    %8 = math.sin %7 : vector<32x256xf32>
    %c0_5 = arith.constant 0 : index
    %c0_6 = arith.constant 0 : index
    %9 = vector.load %arg4[%c0_5, %c0_6] : memref<32x256xf32, #tpu.memory_space<vmem>>, vector<32x256xf32>
    tpu.vector_store %arg4[%c0_5, %c0_6], %8 {strides = array<i32>} : memref<32x256xf32, #tpu.memory_space<vmem>>, vector<32x256xf32>,
    return
  }
  func.func @transform_0(%arg0: i32) -> (i32, i32) {
    %c0_i32 = arith.constant 0 : i32
    %c0_i32_0 = arith.constant 0 : i32
    return %arg0, %c0_i32 : i32, i32
  }
  func.func @transform_1(%arg0: i32) -> (i32, i32) {
    %c0_i32 = arith.constant 0 : i32
    %c0_i32_0 = arith.constant 0 : i32
    %c0_i32_1 = arith.constant 0 : i32
    return %c0_i32, %c0_i32_0 : i32, i32
  }
  func.func @transform_2(%arg0: i32) -> (i32, i32) {
    %c0_i32 = arith.constant 0 : i32
    %c0_i32_0 = arith.constant 0 : i32
    %c0_i32_1 = arith.constant 0 : i32
    return %c0_i32, %c0_i32_0 : i32, i32
  }
  func.func @transform_3(%arg0: i32) -> (i32, i32) {
    %c0_i32 = arith.constant 0 : i32
    %c0_i32_0 = arith.constant 0 : i32
    return %arg0, %c0_i32 : i32, i32
  }
}

</mosaic_0001>

<bundles_post_ra>
// kernel: tpu_custom_call.1
= control target key start
LH: loop header
LB: loop body
LE: loop exit
PB: predicated region body
PF: predicated region fallthrough
CT: control target
= control target key end

     0   :  { %8 = vsyncpa [#allocation3], 0  ;;  %s2698_s0 = inlined_call_operand.vmem [shape: f32[64,1], index: 0, kind: input, shape index: {}]   ;;  %s2699_s1 = inlined_call_operand.vmem [shape: f32[1,256], index: 1, kind: input, shape index: {}]   ;;  %s2700_s2 = inlined_call_operand.vmem [shape: f32[1,256], index: 2, kind: input, shape index: {}]   ;;  %s2701_s3 = inlined_call_operand.hbm [shape: f32[64,256], index: 3, kind: output, shape index: {}]  }
   0x1   :  { %10 = vsyncpa [#allocation3 + $0x1], 0  ;;  %s1733_s12 = smov 0   ;;  %s1735_s13 = smov 0  }
   0x2   :  { %s1737_s14 = smov 0   ;;  %s1739_s15 = smov 0  }
   0x3 LB: > { %s1754_s16 = sadd.s32 4294967295, %s1702_s15   ;;  %s1551_s17 = sadd.s32 4294967294, %s1702_s15   ;;  %s1702_s15 = sphi %s1739_s15, %s2719_s15   ;;  %s1698_s14 = sphi %s1737_s14, %s2718_s14   ;;  %s1694_s13 = sphi %s1735_s13, %s2717_s13   ;;  %s1690_s12 = sphi %s1733_s12, %s2716_s12  }
   0x4   : > { %s1758_s18 = sadd.s32 1, %s1702_s15   ;;  %s91_s19 = sadd.s32 1, %s1698_s14 }
   0x5   : > { %s88_s20 = ssub.s32 %s1702_s15, %s1758_s18  ;;  %p101_p0 = scmp.ne.s32.totalorder %s1698_s14, %s1694_s13 }
   0x6   : > { %p89_p1 = scmp.eq.s32.totalorder %s88_s20, 0  ;;  %p102_p2 = scmp.eq.s32.totalorder %s1754_s16, 1 }
   0x7   : > { %p107_p3 = scmp.ne.s32.totalorder %s1694_s13, %s1690_s12  ;;  %p108_p4 = scmp.eq.s32.totalorder %s1551_s17, 1 }
   0x8   : > { %s1769_s21 = scalar_select %p89_p1, %s1698_s14, %s91_s19  }
   0x9   : > { %p1771_p5 = por %p102_p2, %p101_p0  ;;  %p1775_p6 = por %p108_p4, %p107_p3 }
   0xa   : > { %p1554_p7 = scmp.ge.s32.totalorder %s1702_s15, 1  ;;  %p141_p8 = scmp.lt.s32.totalorder %s1702_s15, 3 }
   0xc   : > { %p142_p9 = pnand %p1554_p7, %p141_p8 }
   0xd   : > { %s1556_s24 = sshll.u32 (!%p142_p9), %s1754_s16, 2  ;;  %s162_s6 = sand.u32 (!%p142_p9), 1, %s1694_s13  }
   0xe   : > { %145 = sbr.rel (%p142_p9) target bundleno = 487 (0x1e7), region = 32  ;;  %p166_p10 = scmp.lt.s32.totalorder (!%p142_p9), %s1556_s24, 7 }
   0xf   : > { %s1555_s7 = sshll.u32 (!%p142_p9), %s162_s6, 6  ;;  %s1589_s9 = sshll.u32 (!%p142_p9), %s1754_s16, 6 }
  0x10   : > { %s2108_s8 = scalar_lea.vmem (!%p142_p9), [#allocation2], %s1555_s7  ;;  %s1485_s17 = scalar_lea.hbm (!%p142_p9), %s2701_s3, %s1589_s9 }
  0x11   : > { %s1486_s19 = sshll.u32 (!%p142_p9), %s2108_s8, 4  ;;  %s1488_s20 = sshll.u32 (!%p142_p9), %s1485_s17, 4  ;;  %s1487_s19 = int_to_ptr.vmem [resolvable:$true] %s1486_s19  ;;  %s1489_s20 = int_to_ptr.hbm [resolvable:$true] %s1488_s20 }
  0x12   : > { %s1473_s16 = scalar_lea.sflag (!%p142_p9), [#allocation3], %s162_s6 }
  0x13   : > { %v1704_v0 = vmov 0   ;;  %s2721_s24 = smov (!%p166_p10, %s1556_s24), 7  ;;  %v176_v5 = vld [vmem:[%s2699_s1] sm:$0x3]  ;;  %v1705_v56 = vmov 683565275  }
  0x14   : > { %1639 = vset.pattern.permute.xlu1 %v1704_v0  ;;  %1638 = vset.pattern.permute.xlu0 %v1704_v0  ;;  %s1557_s25 = sshll.u32 %s2721_s24, 3  ;;  %v177_v6 = vld [vmem:[%s2700_s2] sm:$0x3]  ;;  %v199_v7 = vperm.slane %v176_v5, 0  ;;  %v200_v8 = vperm.slane %v176_v5, 1  ;;  %s1654_s24 = sshra.s32 %s1489_s20, 4  ;;  %s1655_s24 = int_to_ptr.hbm [resolvable:$true] %s1654_s24 }
  0x15   : > { %s169_s28 = scalar_lea.vmem %s2698_s0, %s1557_s25  ;;  %v212_v9 = vperm.slane %v177_v6, 0  ;;  %v213_v10 = vperm.slane %v177_v6, 1  ;;  %v1706_v58 = vmov 2475754826   ;;  %v1707_v62 = vmov 2131351028   ;;  %p1661_p0 = scmp.lt.s32.totalorder %s1655_s24, %s2701_s3 }
  0x16   : > { %v174_v1 = vld [vmem:[%s169_s28 + $0x10] sm:$0xff]  ;;  %v172_v2 = vld [vmem:[%s169_s28] sm:$0xff]  ;;  %v175_v3 = vld [vmem:[%s169_s28 + $0x18] sm:$0xff]  ;;  %v1709_v5 = vmov 920167782   ;;  %s1656_s25 = scalar_lea.hbm %s1655_s24, 64 }
  0x17   : > { %190 = vperm.xlu1 %1639, %v174_v1   ;;  %180 = vperm.xlu0 %1638, %v172_v2   ;;  %v173_v4 = vld [vmem:[%s169_s28 + $0x8] sm:$0xff]  ;;  %v1708_v2 = vmov 2102212464   ;;  %p1657_p11 = scmp.ne.s32.totalorder %s1655_s24, %s1656_s25  ;;  %s1660_s28 = scalar_lea.hbm %s2701_s3, 128 }
  0x18   : > { %p1662_p1 = scmp.lt.s32.totalorder %s1660_s28, %s1656_s25 }
  0x19   : > { %p1658_p12 = pnand %p1657_p11, %p1771_p5 }
  0x1a   : > { %p1663_p2 = por %p1662_p1, %p1661_p0 }
  0x1b   : > { %p1659_p13 = pneg %p1658_p12 }
  0x1d   : > { %p1664_p3 = pnand %p1663_p2, %p1659_p13 }
  0x1f   : > { %195 = vperm.xlu1 %1639, %v175_v3   ;;  %185 = vperm.xlu0 %1638, %v173_v4  }
  0x89   : > { %v191_v11 = vpop.permute.xlu1 %190  ;;  %v181_v12 = vpop.permute.xlu0 %180 }
  0x8a   : > { %v203_v13 = vmul.f32 %v199_v7, %v181_v12  ;;  %v204_v14 = vmul.f32 %v200_v8, %v181_v12  ;;  %v207_v15 = vmul.f32 %v199_v7, %v191_v11  ;;  %v208_v16 = vmul.f32 %v200_v8, %v191_v11 }
  0x8c   : > { %v1793_v17 = vadd.f32 %v212_v9, %v203_v13  ;;  %v1795_v18 = vadd.f32 %v213_v10, %v204_v14  ;;  %v1797_v19 = vadd.f32 %v212_v9, %v207_v15  ;;  %v1799_v20 = vadd.f32 %v213_v10, %v208_v16 }
  0x8e   : > { %v224_v21 = vand.u32 2147483647, %v1793_v17  ;;  %v227_v22 = vand.u32 2139095040, %v1793_v17  ;;  %v379_v23 = vand.u32 2147483647, %v1795_v18  ;;  %v382_v24 = vand.u32 2139095040, %v1795_v18 }
  0x90   : > { %v228_v25 = vshrl.u32 %v227_v22, 23  ;;  %v231_v26 = vand.u32 8388607, %v224_v21  ;;  %v383_v29 = vshrl.u32 %v382_v24, 23  ;;  %v386_v30 = vand.u32 8388607, %v379_v23 }
  0x91   : > { %v196_v27 = vpop.permute.xlu1 %195  ;;  %v186_v28 = vpop.permute.xlu0 %185 }
  0x92   : > { %v205_v31 = vmul.f32 %v199_v7, %v186_v28  ;;  %v206_v32 = vmul.f32 %v200_v8, %v186_v28  ;;  %v209_v33 = vmul.f32 %v199_v7, %v196_v27  ;;  %v210_v34 = vmul.f32 %v200_v8, %v196_v27 }
  0x93   : > { %v1558_v35 = vadd.s32 4294967169, %v228_v25  ;;  %v232_v36 = vor.u32 8388608, %v231_v26  ;;  %v1561_v37 = vadd.s32 4294967169, %v383_v29  ;;  %v387_v41 = vor.u32 8388608, %v386_v30 }
  0x94   : > { %v1809_v38 = vadd.f32 %v213_v10, %v206_v32  ;;  %v1811_v39 = vadd.f32 %v212_v9, %v209_v33  ;;  %v1813_v40 = vadd.f32 %v213_v10, %v210_v34  ;;  %v1815_v44 = vadd.f32 %v212_v9, %v205_v31 }
  0x95   : > { %v234_v42 = vadd.s32 1, %v1558_v35  ;;  %v389_v43 = vadd.s32 1, %v1561_v37  ;;  %v1817_v45 = vshll.u32 %v232_v36, 8  ;;  %v1819_v48 = vshll.u32 %v387_v41, 8 }
  0x96   : > { %v537_v50 = vand.u32 2139095040, %v1815_v44  ;;  %v1710_v8 = vmov 1326507024  }
  0x97   : > { %vm235_vm0 = vcmp.gt.s32.totalorder %v234_v42, 0  ;;  %vm390_vm1 = vcmp.gt.s32.totalorder %v389_v43, 0  ;;  %v1823_v52 = vand.u32 65535, %v1817_v45  ;;  %v1826_v53 = vshrl.u32 %v1817_v45, 16 }
  0x98   : > { %v236_v46 = vsel %vm235_vm0, %v234_v42, 0  ;;  %v391_v47 = vsel %vm390_vm1, %v389_v43, 0  ;;  %v1835_v60 = vand.u32 65535, %v1819_v48 }
  0x99   : > { %v238_v49 = vand.u32 31, %v236_v46  ;;  %v1828_v54 = vand.u32 31, %v391_v47  ;;  %v1830_v55 = vshrl.u32 %v236_v46, 5 }
  0x9b   : > { %v239_v51 = vsub.s32 32, %v238_v49  ;;  %v241_v57 = vshll.u32 %v1705_v56, %v238_v49  ;;  %v244_v59 = vshll.u32 %v1706_v58, %v238_v49  ;;  %v247_v1 = vshll.u32 %v1707_v62, %v238_v49 }
  0x9c   : > { %v250_v4 = vshll.u32 %v1708_v2, %v238_v49  ;;  %v253_v7 = vshll.u32 %v1709_v5, %v238_v49  ;;  %v1846_v13 = vsub.s32 32, %v1828_v54  ;;  %vm256_vm2 = vcmp.lt.s32.totalorder %v1830_v55, 1 }
  0x9d   : > { %v242_v61 = vshrl.u32 %v1706_v58, %v239_v51  ;;  %v245_v63 = vshrl.u32 %v1707_v62, %v239_v51  ;;  %v248_v3 = vshrl.u32 %v1708_v2, %v239_v51  ;;  %v251_v6 = vshrl.u32 %v1709_v5, %v239_v51 }
  0x9e   : > { %v254_v9 = vshrl.u32 %v1710_v8, %v239_v51  ;;  %vm257_vm3 = vcmp.lt.s32.totalorder %v1830_v55, 2  ;;  %v240_v16 = vshrl.u32 %v1705_v56, %v239_v51  ;;  %vm259_vm4 = vcmp.lt.s32.totalorder %v1830_v55, 4 }
  0x9f   : > { %v243_v10 = vor.u32 %v242_v61, %v241_v57  ;;  %v246_v11 = vor.u32 %v245_v63, %v244_v59  ;;  %v249_v12 = vor.u32 %v248_v3, %v247_v1  ;;  %v252_v14 = vor.u32 %v251_v6, %v250_v4 }
  0xa0   : > { %v255_v15 = vor.u32 %v254_v9, %v253_v7  ;;  %vm258_vm5 = vcmp.lt.s32.totalorder %v1830_v55, 3  ;;  %v396_v27 = vshll.u32 %v1705_v56, %v1828_v54  ;;  %v397_v31 = vshrl.u32 %v1706_v58, %v1846_v13 }
  0xa1   : > { %v264_v22 = vsel %vm256_vm2, %v243_v10, %v246_v11  ;;  %v268_v24 = vsel %vm256_vm2, %v246_v11, %v249_v12  ;;  %v265_v25 = vsel %vm259_vm4, %v252_v14, 920167782  ;;  %v261_v28 = vsel %vm259_vm4, %v249_v12, 2102212464 }
  0xa2   : > { %v269_v26 = vsel %vm259_vm4, %v255_v15, 1326507024  ;;  %v266_v29 = vsel %vm258_vm5, %v249_v12, %v265_v25  ;;  %v399_v34 = vshll.u32 %v1706_v58, %v1828_v54  ;;  %v400_v35 = vshrl.u32 %v1707_v62, %v1846_v13 }
  0xa3   : > { %v270_v30 = vsel %vm258_vm5, %v252_v14, %v269_v26  ;;  %v267_v32 = vsel %vm257_vm3, %v264_v22, %v266_v29  ;;  %v260_v43 = vsel %vm256_vm2, %v240_v16, %v243_v10  ;;  %v262_v46 = vsel %vm258_vm5, %v246_v11, %v261_v28 }
  0xa4   : > { %v271_v33 = vsel %vm257_vm3, %v268_v24, %v270_v30  ;;  %v297_v41 = vand.u32 65535, %v267_v32  ;;  %v298_v42 = vshrl.u32 %v267_v32, 16  ;;  %v1877_v49 = vshrl.u32 %v391_v47, 5 }
  0xa5   : > { %v275_v36 = vand.u32 65535, %v271_v33  ;;  %v276_v37 = vshrl.u32 %v271_v33, 16  ;;  %v1879_v51 = vor.u32 %v397_v31, %v396_v27  ;;  %v1883_v61 = vor.u32 %v400_v35, %v399_v34 }
  0xa6   : > { %v403_v63 = vshrl.u32 %v1708_v2, %v1846_v13  ;;  %v300_v3 = vmul.u32 %v298_v42, %v1823_v52  ;;  %v301_v4 = vmul.u32 %v297_v41, %v1826_v53  ;;  %v402_v47 = vshll.u32 %v1707_v62, %v1828_v54 }
  0xa7   : > { %v278_v57 = vmul.u32 %v276_v37, %v1823_v52  ;;  %v279_v59 = vmul.u32 %v275_v36, %v1826_v53  ;;  %v277_v1 = vmul.u32 %v275_v36, %v1823_v52  ;;  %v280_v6 = vmul.u32 %v276_v37, %v1826_v53 }
  0xa8   : > { %v299_v9 = vmul.u32 %v297_v41, %v1823_v52  ;;  %v302_v10 = vmul.u32 %v298_v42, %v1826_v53  ;;  %v303_v15 = vshll.u32 %v300_v3, 16  ;;  %v305_v22 = vshll.u32 %v301_v4, 16 }
  0xa9   : > { %v281_v7 = vshll.u32 %v278_v57, 16  ;;  %v282_v11 = vshrl.u32 %v278_v57, 16  ;;  %v283_v12 = vshll.u32 %v279_v59, 16  ;;  %v284_v14 = vshrl.u32 %v279_v59, 16 }
  0xaa   : > { %v404_v24 = vor.u32 %v403_v63, %v402_v47  ;;  %vm307_vm7 = vc.u32 %v299_v9, %v303_v15  ;;  %v309_v26 = vadd.s32 %v303_v15, %v299_v9  ;;  %v406_v27 = vshrl.u32 %v1709_v5, %v1846_v13 }
  0xab   : > { %vm285_vm6 = vc.u32 %v277_v1, %v281_v7  ;;  %v287_v16 = vadd.s32 %v281_v7, %v277_v1  ;;  %v308_v52 = vsel %vm307_vm7, 1, %v1704_v0  ;;  %v405_v53 = vshll.u32 %v1708_v2, %v1828_v54 }
  0xac   : > { %v286_v25 = vsel %vm285_vm6, 1, %v1704_v0  ;;  %v310_v30 = vadd.s32 %v308_v52, %v302_v10  ;;  %vm311_vm9 = vc.u32 %v309_v26, %v305_v22  ;;  %v408_v31 = vshll.u32 %v1709_v5, %v1828_v54 }
  0xad   : > { %v288_v28 = vadd.s32 %v286_v25, %v280_v6  ;;  %vm289_vm8 = vc.u32 %v287_v16, %v283_v12  ;;  %v312_v33 = vsel %vm311_vm9, 1, %v1704_v0  ;;  %v407_v34 = vor.u32 %v406_v27, %v405_v53 }
  0xae   : > { %v290_v29 = vsel %vm289_vm8, 1, %v1704_v0  ;;  %v409_v35 = vshrl.u32 %v1710_v8, %v1846_v13  ;;  %v304_v36 = vshrl.u32 %v300_v3, 16  ;;  %v306_v37 = vshrl.u32 %v301_v4, 16 }
  0xaf   : > { %v292_v32 = vadd.s32 %v290_v29, %v288_v28  ;;  %v1907_v41 = vadd.s32 %v309_v26, %v305_v22  ;;  %v314_v42 = vadd.s32 %v312_v33, %v310_v30  ;;  %vm411_vm10 = vcmp.lt.s32.totalorder %v1877_v49, 1 }
  0xb0   : > { %v410_v59 = vor.u32 %v409_v35, %v408_v31  ;;  %vm414_vm11 = vcmp.lt.s32.totalorder %v1877_v49, 4  ;;  %vm413_vm12 = vcmp.lt.s32.totalorder %v1877_v49, 3  ;;  %v419_v54 = vsel %vm411_vm10, %v1879_v51, %v1883_v61 }
  0xb1   : > { %v293_v57 = vadd.s32 %v292_v32, %v282_v11  ;;  %v315_v63 = vadd.s32 %v314_v42, %v304_v36  ;;  %v420_v1 = vsel %vm414_vm11, %v407_v34, 920167782  ;;  %vm412_vm13 = vcmp.lt.s32.totalorder %v1877_v49, 2 }
  0xb2   : > { %v421_v4 = vsel %vm413_vm12, %v404_v24, %v420_v1  ;;  %v423_v47 = vsel %vm411_vm10, %v1883_v61, %v404_v24  ;;  %v263_v6 = vsel %vm257_vm3, %v260_v43, %v262_v46  ;;  %v424_v10 = vsel %vm414_vm11, %v410_v59, 1326507024 }
  0xb3   : > { %v1918_v3 = vadd.s32 %v293_v57, %v284_v14  ;;  %v316_v7 = vadd.s32 %v315_v63, %v306_v37  ;;  %v422_v9 = vsel %vm412_vm13, %v419_v54, %v421_v4  ;;  %v425_v11 = vsel %vm413_vm12, %v407_v34, %v424_v10 }
  0xb4   : > { %v429_v12 = vshrl.u32 %v1819_v48, 16  ;;  %v452_v14 = vand.u32 65535, %v422_v9  ;;  %v426_v55 = vsel %vm412_vm13, %v423_v47, %v425_v11  ;;  %v453_v43 = vshrl.u32 %v422_v9, 16 }
  0xb5   : > { %vm319_vm14 = vc.u32 %v1918_v3, %v1907_v41  ;;  %v320_v15 = vadd.s32 1, %v316_v7  ;;  %v538_v46 = vshrl.u32 %v537_v50, 23  ;;  %v317_v16 = vmul.u32 %v1817_v45, %v263_v6 }
  0xb6   : > { %v430_v22 = vand.u32 65535, %v426_v55  ;;  %v431_v25 = vshrl.u32 %v426_v55, 16  ;;  %v534_v26 = vand.u32 2147483647, %v1815_v44  ;;  %v395_v28 = vshrl.u32 %v1705_v56, %v1846_v13 }
  0xb7   : > { %v321_v27 = vsel %vm319_vm14, %v320_v15, %v316_v7  ;;  %v455_v52 = vmul.u32 %v453_v43, %v1835_v60  ;;  %v456_v53 = vmul.u32 %v452_v14, %v429_v12  ;;  %v416_v30 = vsel %vm414_vm11, %v404_v24, 2102212464 }
  0xb8   : > { %v322_v29 = vadd.s32 %v321_v27, %v317_v16  ;;  %v433_v31 = vmul.u32 %v431_v25, %v1835_v60  ;;  %v434_v50 = vmul.u32 %v430_v22, %v429_v12  ;;  %v454_v45 = vmul.u32 %v452_v14, %v1835_v60 }
  0xb9   : > { %v457_v32 = vmul.u32 %v453_v43, %v429_v12  ;;  %v458_v33 = vshll.u32 %v455_v52, 16  ;;  %v1564_v34 = vadd.s32 4294967169, %v538_v46  ;;  %v432_v36 = vmul.u32 %v430_v22, %v1835_v60 }
  0xba   : > { %v323_v35 = vadd.s32 536870912, %v322_v29  ;;  %v435_v37 = vmul.u32 %v431_v25, %v429_v12  ;;  %v436_v13 = vshll.u32 %v433_v31, 16  ;;  %v438_v42 = vshll.u32 %v434_v50, 16 }
  0xbb   : > { %v460_v57 = vshll.u32 %v456_v53, 16  ;;  %vm462_vm15 = vc.u32 %v454_v45, %v458_v33  ;;  %v464_v59 = vadd.s32 %v458_v33, %v454_v45  ;;  %v541_v47 = vand.u32 8388607, %v534_v26 }
  0xbc   : > { %v324_v63 = vshrl.u32 %v323_v35, 30  ;;  %vm440_vm0 = vc.u32 %v432_v36, %v436_v13  ;;  %v442_v24 = vadd.s32 %v436_v13, %v432_v36  ;;  %v463_v54 = vsel %vm462_vm15, 1, %v1704_v0 }
  0xbd   : > { %v441_v1 = vsel %vm440_vm0, 1, %v1704_v0  ;;  %v465_v4 = vadd.s32 %v463_v54, %v457_v32  ;;  %vm466_vm1 = vc.u32 %v464_v59, %v460_v57  ;;  %v415_v60 = vsel %vm411_vm10, %v395_v28, %v1879_v51 }
  0xbe   : > { %v325_v6 = vshll.u32 %v324_v63, 30  ;;  %v443_v7 = vadd.s32 %v441_v1, %v435_v37  ;;  %vm444_vm2 = vc.u32 %v442_v24, %v438_v42  ;;  %v417_v9 = vsel %vm413_vm12, %v1883_v61, %v416_v30 }
  0xbf   : > { %v445_v10 = vsel %vm444_vm2, 1, %v1704_v0  ;;  %v467_v11 = vsel %vm466_vm1, 1, %v1704_v0  ;;  %v544_v12 = vadd.s32 1, %v1564_v34  ;;  %v437_v15 = vshrl.u32 %v433_v31, 16 }
  0xc0   : > { %v326_v14 = vsub.s32 %v322_v29, %v325_v6  ;;  %v447_v55 = vadd.s32 %v445_v10, %v443_v7  ;;  %v469_v43 = vadd.s32 %v467_v11, %v465_v4  ;;  %vm226_vm3 = vcmp.lt.s32.totalorder %v1793_v17, 0 }
  0xc1   : > { %v348_v46 = vsub.s32 4, %v324_v63  ;;  %v459_v16 = vshrl.u32 %v455_v52, 16  ;;  %vm545_vm4 = vcmp.gt.s32.totalorder %v544_v12, 0  ;;  %v439_v22 = vshrl.u32 %v434_v50, 16 }
  0xc2   : > { %vm327_vm5 = vcmp.lt.s32.totalorder %v326_v14, 0  ;;  %v328_v51 = vsub.s32 0, %v326_v14  ;;  %v448_v25 = vadd.s32 %v447_v55, %v437_v15  ;;  %v418_v61 = vsel %vm412_vm13, %v415_v60, %v417_v9 }
  0xc3   : > { %v461_v27 = vshrl.u32 %v456_v53, 16  ;;  %v470_v28 = vadd.s32 %v469_v43, %v459_v16  ;;  %v546_v30 = vsel %vm545_vm4, %v544_v12, 0  ;;  %v1968_v31 = vadd.s32 %v464_v59, %v460_v57 }
  0xc4   : > { %v329_v45 = vsel %vm327_vm5, %v328_v51, %v326_v14  ;;  %v1966_v29 = vadd.s32 %v448_v25, %v439_v22  ;;  %v542_v32 = vor.u32 8388608, %v541_v47  ;;  %v349_v52 = vsel %vm226_vm3, %v348_v46, %v324_v63 }
  0xc5   : > { %v330_v33 = vclz %v329_v45  ;;  %v471_v34 = vadd.s32 %v470_v28, %v461_v27  ;;  %v548_v35 = vand.u32 31, %v546_v30  ;;  %vm1974_vm6 = vcmp.le.f32.partialorder %v224_v21, 0.7853982 }
  0xc6   : > { %v318_v53 = vadd.s32 %v1907_v41, %v1918_v3  ;;  %v472_v50 = vmul.u32 %v1819_v48, %v418_v61  ;;  %vm474_vm7 = vc.u32 %v1966_v29, %v1968_v31  ;;  %v351_v42 = vsel %vm1974_vm6, 0, %v349_v52 }
  0xc7   : > { %v1559_v36 = vadd.s32 4294967294, %v330_v33  ;;  %v475_v37 = vadd.s32 1, %v471_v34  ;;  %v549_v13 = vsub.s32 32, %v548_v35  ;;  %v1985_v57 = vshrl.u32 %v546_v30, 5 }
  0xc8   : > { %v551_v21 = vshll.u32 %v1705_v56, %v548_v35  ;;  %v1988_v59 = vshll.u32 %v542_v32, 8  ;;  %v554_v48 = vshll.u32 %v1706_v58, %v548_v35  ;;  %v557_v1 = vshll.u32 %v1707_v62, %v548_v35 }
  0xc9   : > { %vm1560_vm8 = vcmp.lt.s32.totalorder %v1559_v36, 0  ;;  %v476_v63 = vsel %vm474_vm7, %v475_v37, %v471_v34  ;;  %v552_v41 = vshrl.u32 %v1706_v58, %v549_v13  ;;  %v555_v54 = vshrl.u32 %v1707_v62, %v549_v13 }
  0xca   : > { %v333_v3 = vsel %vm1560_vm8, 0, %v1559_v36  ;;  %v477_v24 = vadd.s32 %v476_v63, %v472_v50  ;;  %v558_v6 = vshrl.u32 %v1708_v2, %v549_v13  ;;  %v560_v60 = vshll.u32 %v1708_v2, %v548_v35 }
  0xcb   : > { %v334_v4 = vsub.s32 32, %v333_v3  ;;  %v338_v47 = vsub.s32 4294967266, %v333_v3  ;;  %v335_v7 = vshll.u32 %v326_v14, %v333_v3  ;;  %v553_v10 = vor.u32 %v552_v41, %v551_v21 }
  0xcc   : > { %v478_v9 = vadd.s32 536870912, %v477_v24  ;;  %v561_v11 = vshrl.u32 %v1709_v5, %v549_v13  ;;  %v1997_v55 = vor.u32 %v555_v54, %v554_v48  ;;  %v564_v43 = vshrl.u32 %v1710_v8, %v549_v13 }
  0xcd   : > { %v336_v12 = vshrl.u32 %v318_v53, %v334_v4  ;;  %v339_v15 = vadd.s32 127, %v338_v47  ;;  %v559_v25 = vor.u32 %v558_v6, %v557_v1  ;;  %v563_v61 = vshll.u32 %v1709_v5, %v548_v35 }
  0xce   : > { %v479_v46 = vshrl.u32 %v478_v9, 30  ;;  %v562_v16 = vor.u32 %v561_v11, %v560_v60  ;;  %v368_v27 = vadd.s32 3, %v351_v42  ;;  %vm566_vm9 = vcmp.lt.s32.totalorder %v1985_v57, 1 }
  0xcf   : > { %v337_v51 = vor.u32 %v336_v12, %v335_v7  ;;  %v340_v22 = vshll.u32 %v339_v15, 23  ;;  %v583_v14 = vand.u32 65535, %v1988_v59  ;;  %vm381_vm10 = vcmp.lt.s32.totalorder %v1795_v18, 0 }
  0xd0   : > { %v480_v28 = vshll.u32 %v479_v46, 30  ;;  %v565_v45 = vor.u32 %v564_v43, %v563_v61  ;;  %vm569_vm11 = vcmp.lt.s32.totalorder %v1985_v57, 4  ;;  %v574_v32 = vsel %vm566_vm9, %v553_v10, %v1997_v55 }
  0xd1   : > { %v341_v30 = vor.u32 4788187, %v340_v22  ;;  %vm568_vm12 = vcmp.lt.s32.totalorder %v1985_v57, 3  ;;  %v575_v52 = vsel %vm569_vm11, %v562_v16, 920167782  ;;  %v584_v34 = vshrl.u32 %v1988_v59, 16 }
  0xd2   : > { %v2008_v33 = vsub.s32 %v477_v24, %v480_v28  ;;  %v344_v53 = vcvt.s32.f32 %v337_v51  ;;  %vm567_vm13 = vcmp.lt.s32.totalorder %v1985_v57, 2  ;;  %v576_v50 = vsel %vm568_vm12, %v559_v25, %v575_v52 }
  0xd3   : > { %v342_v35 = vand.u32 2147483647, %v341_v30  ;;  %v2017_v36 = vand.u32 3, %v368_v27  ;;  %v577_v42 = vsel %vm567_vm13, %v574_v32, %v576_v50  ;;  %v550_v63 = vshrl.u32 %v1705_v56, %v549_v13 }
  0xd4   : > { %vm482_vm14 = vcmp.lt.s32.totalorder %v2008_v33, 0  ;;  %v483_v37 = vsub.s32 0, %v2008_v33  ;;  %v578_v41 = vsel %vm566_vm9, %v1997_v55, %v559_v25  ;;  %v579_v48 = vsel %vm569_vm11, %v565_v45, 1326507024 }
  0xd5   : > { %v345_v21 = vmul.f32 %v344_v53, %v342_v35  ;;  %v503_v24 = vsub.s32 4, %v479_v46  ;;  %v580_v54 = vsel %vm568_vm12, %v562_v16, %v579_v48  ;;  %v607_v1 = vand.u32 65535, %v577_v42 }
  0xd6   : > { %v484_v3 = vsel %vm482_vm14, %v483_v37, %v2008_v33  ;;  %v581_v6 = vsel %vm567_vm13, %v578_v41, %v580_v54  ;;  %v608_v13 = vshrl.u32 %v577_v42, 16  ;;  %v473_v60 = vadd.s32 %v1968_v31, %v1966_v29 }
  0xd7   : > { %v346_v4 = vxor.u32 2147483648, %v345_v21  ;;  %v485_v47 = vclz %v484_v3  ;;  %v2038_v7 = vsel %vm566_vm9, %v550_v63, %v553_v10  ;;  %v585_v9 = vand.u32 65535, %v581_v6 }
  0xd8   : > { %v689_v11 = vand.u32 2147483647, %v1809_v38  ;;  %v571_v43 = vsel %vm569_vm11, %v559_v25, 2102212464  ;;  %v586_v16 = vshrl.u32 %v581_v6, 16  ;;  %v2052_v29 = vsel %vm381_vm10, %v503_v24, %v479_v46 }
  0xd9   : > { %v347_v12 = vsel %vm226_vm3, %v346_v4, %v345_v21  ;;  %v1562_v15 = vadd.s32 4294967294, %v485_v47  ;;  %v589_v31 = vmul.u32 %v585_v9, %v584_v34  ;;  %v609_v10 = vmul.u32 %v607_v1, %v583_v14 }
  0xda   : > { %v2048_v51 = vsel %vm1974_vm6, %v1793_v17, %v347_v12  ;;  %v588_v61 = vmul.u32 %v586_v16, %v583_v14  ;;  %v2056_v27 = vmul.u32 %v608_v13, %v583_v14  ;;  %v587_v28 = vmul.u32 %v585_v9, %v583_v14 }
  0xdb   : > { %v352_v22 = vmul.f32 %v2048_v51, %v2048_v51  ;;  %vm1563_vm15 = vcmp.lt.s32.totalorder %v1562_v15, 0  ;;  %v590_v30 = vmul.u32 %v586_v16, %v584_v34  ;;  %v2058_v45 = vmul.u32 %v607_v1, %v584_v34 }
  0xdc   : > { %v488_v25 = vsel %vm1563_vm15, 0, %v1562_v15  ;;  %v593_v35 = vshll.u32 %v589_v31, 16  ;;  %v591_v53 = vshll.u32 %v588_v61, 16  ;;  %v594_v50 = vshrl.u32 %v589_v31, 16 }
  0xdd   : > { %v353_v49 = vmul.f32 -0.001358992, %v352_v22  ;;  %v360_v32 = vmul.f32 -0.00019511016, %v352_v22  ;;  %v489_v52 = vsub.s32 32, %v488_v25  ;;  %v493_v46 = vsub.s32 4294967266, %v488_v25 }
  0xde   : > { %v612_v37 = vmul.u32 %v608_v13, %v584_v34  ;;  %v490_v63 = vshll.u32 %v2008_v33, %v488_v25  ;;  %vm595_vm0 = vc.u32 %v587_v28, %v591_v53  ;;  %v597_v3 = vadd.s32 %v591_v53, %v587_v28 }
  0xdf   : > { %v354_v42 = vadd.f32 0.041655596, %v353_v49  ;;  %v361_v21 = vadd.f32 0.008332121, %v360_v32  ;;  %v491_v41 = vshrl.u32 %v473_v60, %v489_v52  ;;  %v494_v48 = vadd.s32 127, %v493_v46 }
  0xe0   : > { %v613_v14 = vshll.u32 %v2056_v27, 16  ;;  %v596_v4 = vsel %vm595_vm0, 1, %v1704_v0  ;;  %vm2065_vm1 = vcmp.le.f32.partialorder %v379_v23, 0.7853982  ;;  %v592_v6 = vshrl.u32 %v588_v61, 16 }
  0xe1   : > { %v355_v24 = vmul.f32 %v354_v42, %v352_v22  ;;  %v362_v54 = vmul.f32 %v361_v21, %v352_v22  ;;  %v492_v1 = vor.u32 %v491_v41, %v490_v63  ;;  %v495_v34 = vshll.u32 %v494_v48, 23 }
  0xe2   : > { %v598_v33 = vadd.s32 %v596_v4, %v590_v30  ;;  %vm599_vm2 = vc.u32 %v597_v3, %v593_v35  ;;  %v615_v12 = vshll.u32 %v2058_v45, 16  ;;  %vm371_vm3 = vcmp.eq.s32.totalorder %v2017_v36, 0 }
  0xe3   : > { %v356_v13 = vadd.f32 -0.4999988, %v355_v24  ;;  %v363_v60 = vadd.f32 -0.16666654, %v362_v54  ;;  %v600_v9 = vsel %vm599_vm2, 1, %v1704_v0  ;;  %vm617_vm4 = vc.u32 %v609_v10, %v613_v14 }
  0xe4   : > { %v496_v15 = vor.u32 4788187, %v495_v34  ;;  %v602_v16 = vadd.s32 %v600_v9, %v598_v33  ;;  %v619_v23 = vadd.s32 %v613_v14, %v609_v10  ;;  %vm370_vm5 = vcmp.lt.s32.totalorder %v2017_v36, 2 }
  0xe5   : > { %v357_v31 = vmul.f32 %v356_v13, %v352_v22  ;;  %v364_v25 = vmul.f32 %v363_v60, %v352_v22  ;;  %v499_v61 = vcvt.s32.f32 %v492_v1  ;;  %v618_v28 = vsel %vm617_vm4, 1, %v1704_v0 }
  0xe6   : > { %v497_v30 = vand.u32 2147483647, %v496_v15  ;;  %v603_v49 = vadd.s32 %v602_v16, %v592_v6  ;;  %v620_v32 = vadd.s32 %v618_v28, %v612_v37  ;;  %vm621_vm6 = vc.u32 %v619_v23, %v615_v12 }
  0xe7   : > { %v358_v52 = vadd.f32 1.0, %v357_v31  ;;  %v365_v35 = vadd.f32 1.0, %v364_v25  ;;  %v572_v46 = vsel %vm568_vm12, %v1997_v55, %v571_v43  ;;  %v622_v10 = vsel %vm621_vm6, 1, %v1704_v0 }
  0xe8   : > { %v500_v22 = vmul.f32 %v499_v61, %v497_v30  ;;  %v604_v53 = vadd.s32 %v603_v49, %v594_v50  ;;  %v614_v42 = vshrl.u32 %v2056_v27, 16  ;;  %v624_v21 = vadd.s32 %v622_v10, %v620_v32 }
  0xe9   : > { %v366_v63 = vmul.f32 %v365_v35, %v2048_v51  ;;  %vm374_vm7 = vcmp.eq.s32.totalorder %v2017_v36, 2  ;;  %v375_v37 = vxor.u32 2147483648, %v358_v52  ;;  %v692_v41 = vand.u32 2139095040, %v1809_v38 }
  0xea   : > { %v501_v48 = vxor.u32 2147483648, %v500_v22  ;;  %v616_v3 = vshrl.u32 %v2058_v45, 16  ;;  %v623_v55 = vadd.s32 %v619_v23, %v615_v12  ;;  %v625_v43 = vadd.s32 %v624_v21, %v614_v42 }
  0xeb   : > { %v372_v14 = vxor.u32 2147483648, %v366_v63  ;;  %v506_v27 = vsel %vm2065_vm1, 0, %v2052_v29  ;;  %v573_v51 = vsel %vm567_vm13, %v2038_v7, %v572_v46  ;;  %v693_v50 = vshrl.u32 %v692_v41, 23 }
  0xec   : > { %v502_v24 = vsel %vm381_vm10, %v501_v48, %v500_v22  ;;  %v626_v54 = vadd.s32 %v625_v43, %v616_v3  ;;  %vm629_vm8 = vc.u32 %v604_v53, %v623_v55  ;;  %v696_v45 = vand.u32 8388607, %v689_v11 }
  0xed   : > { %v373_v1 = vsel %vm371_vm3, %v358_v52, %v372_v14  ;;  %v376_v4 = vsel %vm374_vm7, %v375_v37, %v366_v63  ;;  %v505_v57 = vsel %vm2065_vm1, %v1795_v18, %v502_v24  ;;  %v1567_v7 = vadd.s32 4294967169, %v693_v50 }
  0xee   : > { %vm367_vm9 = vweird.f32 %v1793_v17  ;;  %v377_v29 = vsel %vm370_vm5, %v373_v1, %v376_v4  ;;  %v507_v34 = vmul.f32 %v505_v57, %v505_v57  ;;  %v630_v6 = vadd.s32 1, %v626_v54 }
  0xef   : > { %v378_v33 = vsel %vm367_vm9, nan, %v377_v29  ;;  %v523_v13 = vadd.s32 3, %v506_v27  ;;  %v627_v60 = vmul.u32 %v1988_v59, %v573_v51  ;;  %v699_v9 = vadd.s32 1, %v1567_v7 }
  0xf0   : > { %v508_v12 = vmul.f32 -0.001358992, %v507_v34  ;;  %v515_v15 = vmul.f32 -0.00019511016, %v507_v34  ;;  %v631_v16 = vsel %vm629_vm8, %v630_v6, %v626_v54  ;;  %v697_v23 = vor.u32 8388608, %v696_v45  ;;  %1464 = vst [vmem:[%s2108_s8] sm:$0xff] %v378_v33 }
  0xf1   : > { %v632_v17 = vadd.s32 %v631_v16, %v627_v60  ;;  %vm700_vm10 = vcmp.gt.s32.totalorder %v699_v9, 0  ;;  %v524_v25 = vand.u32 3, %v523_v13  ;;  %v847_v32 = vand.u32 2139095040, %v1797_v19 }
  0xf2   : > { %v509_v36 = vadd.f32 0.041655596, %v508_v12  ;;  %v516_v47 = vadd.f32 0.008332121, %v515_v15  ;;  %v701_v31 = vsel %vm700_vm10, %v699_v9, 0  ;;  %v2111_v49 = vshll.u32 %v697_v23, 8 }
  0xf3   : > { %v633_v61 = vadd.s32 536870912, %v632_v17  ;;  %v703_v28 = vand.u32 31, %v701_v31  ;;  %vm526_vm11 = vcmp.eq.s32.totalorder %v524_v25, 0  ;;  %vm529_vm12 = vcmp.eq.s32.totalorder %v524_v25, 2 }
  0xf4   : > { %v510_v30 = vmul.f32 %v509_v36, %v507_v34  ;;  %v517_v59 = vmul.f32 %v516_v47, %v507_v34  ;;  %v2118_v22 = vadd.s32 %v623_v55, %v604_v53  ;;  %v844_v21 = vand.u32 2147483647, %v1797_v19 }
  0xf5   : > { %v2114_v52 = vshrl.u32 %v633_v61, 30  ;;  %v2116_v35 = vsub.s32 32, %v703_v28  ;;  %vm525_vm13 = vcmp.lt.s32.totalorder %v524_v25, 2  ;;  %v2123_v41 = vand.u32 65535, %v2111_v49 }
  0xf6   : > { %v511_v46 = vadd.f32 -0.4999988, %v510_v30  ;;  %v518_v10 = vadd.f32 -0.16666654, %v517_v59  ;;  %v848_v48 = vshrl.u32 %v847_v32, 23  ;;  %vm522_vm14 = vweird.f32 %v1795_v18 }
  0xf7   : > { %v635_v42 = vshll.u32 %v2114_v52, 30  ;;  %v2128_v43 = vshrl.u32 %v701_v31, 5  ;;  %v707_v53 = vshrl.u32 %v1706_v58, %v2116_v35  ;;  %v710_v55 = vshrl.u32 %v1707_v62, %v2116_v35 }
  0xf8   : > { %v512_v63 = vmul.f32 %v511_v46, %v507_v34  ;;  %v519_v37 = vmul.f32 %v518_v10, %v507_v34  ;;  %v706_v51 = vshll.u32 %v1705_v56, %v703_v28  ;;  %v716_v50 = vshrl.u32 %v1709_v5, %v2116_v35 }
  0xf9   : > { %v2126_v3 = vsub.s32 %v632_v17, %v635_v42  ;;  %v709_v54 = vshll.u32 %v1706_v58, %v703_v28  ;;  %v713_v45 = vshrl.u32 %v1708_v2, %v2116_v35  ;;  %v712_v7 = vshll.u32 %v1707_v62, %v703_v28 }
  0xfa   : > { %v513_v14 = vadd.f32 1.0, %v512_v63  ;;  %v520_v27 = vadd.f32 1.0, %v519_v37  ;;  %v715_v29 = vshll.u32 %v1708_v2, %v703_v28  ;;  %v708_v6 = vor.u32 %v707_v53, %v706_v51 }
  0xfb   : > { %vm637_vm15 = vcmp.lt.s32.totalorder %v2126_v3, 0  ;;  %v638_v24 = vsub.s32 0, %v2126_v3  ;;  %v711_v33 = vor.u32 %v710_v55, %v709_v54  ;;  %v719_v13 = vshrl.u32 %v1710_v8, %v2116_v35 }
  0xfc   : > { %v521_v1 = vmul.f32 %v520_v27, %v505_v57  ;;  %v530_v4 = vxor.u32 2147483648, %v513_v14  ;;  %v717_v12 = vor.u32 %v716_v50, %v715_v29  ;;  %v739_v15 = vshrl.u32 %v2111_v49, 16 }
  0xfd   : > { %v639_v34 = vsel %vm637_vm15, %v638_v24, %v2126_v3  ;;  %v714_v16 = vor.u32 %v713_v45, %v712_v7  ;;  %v718_v57 = vshll.u32 %v1709_v5, %v703_v28  ;;  %v2149_v23 = vadd.s32 4294967169, %v848_v48 }
  0xfe   : > { %v527_v60 = vxor.u32 2147483648, %v521_v1  ;;  %v640_v9 = vclz %v639_v34  ;;  %v2153_v17 = vand.u32 8388607, %v844_v21  ;;  %v531_v47 = vsel %vm529_vm12, %v530_v4, %v521_v1 }
  0xff   : > { %vm536_vm0 = vcmp.lt.s32.totalorder %v1815_v44, 0  ;;  %vm721_vm1 = vcmp.lt.s32.totalorder %v2128_v43, 1  ;;  %v720_v30 = vor.u32 %v719_v13, %v718_v57  ;;  %vm724_vm2 = vcmp.lt.s32.totalorder %v2128_v43, 4 }
 0x100   : > { %v528_v36 = vsel %vm526_vm11, %v513_v14, %v527_v60  ;;  %v1565_v31 = vadd.s32 4294967294, %v640_v9  ;;  %v729_v28 = vsel %vm721_vm1, %v708_v6, %v711_v33  ;;  %vm723_vm4 = vcmp.lt.s32.totalorder %v2128_v43, 3 }
 0x101   : > { %v532_v61 = vsel %vm525_vm13, %v528_v36, %v531_v47  ;;  %v730_v32 = vsel %vm724_vm2, %v717_v12, 920167782  ;;  %v658_v10 = vsub.s32 4, %v2114_v52  ;;  %vm722_vm5 = vcmp.lt.s32.totalorder %v2128_v43, 2 }
 0x102   : > { %v533_v59 = vsel %vm522_vm14, nan, %v532_v61  ;;  %vm1566_vm3 = vcmp.lt.s32.totalorder %v1565_v31, 0  ;;  %v731_v25 = vsel %vm723_vm4, %v714_v16, %v730_v32  ;;  %v733_v37 = vsel %vm721_vm1, %v711_v33, %v714_v16 }
 0x103   : > { %v643_v46 = vsel %vm1566_vm3, 0, %v1565_v31  ;;  %1465 = vst [vmem:[%s2108_s8 + $0x8] sm:$0xff] %v533_v59  ;;  %v732_v18 = vsel %vm722_vm5, %v729_v28, %v731_v25  ;;  %v705_v48 = vshrl.u32 %v1705_v56, %v2116_v35  ;;  %v734_v53 = vsel %vm724_vm2, %v720_v30, 1326507024 }
 0x104   : > { %v644_v42 = vsub.s32 32, %v643_v46  ;;  %v648_v63 = vsub.s32 4294967266, %v643_v46  ;;  %v762_v55 = vand.u32 65535, %v732_v18  ;;  %v763_v14 = vshrl.u32 %v732_v18, 16 }
 0x105   : > { %vm2183_vm6 = vcmp.le.f32.partialorder %v534_v26, 0.7853982  ;;  %v645_v51 = vshll.u32 %v2126_v3, %v643_v46  ;;  %v735_v54 = vsel %vm723_vm4, %v717_v12, %v734_v53  ;;  %v726_v35 = vsel %vm724_vm2, %v714_v16, 2102212464 }
 0x106   : > { %v646_v50 = vshrl.u32 %v2118_v22, %v644_v42  ;;  %v649_v24 = vadd.s32 127, %v648_v63  ;;  %v736_v45 = vsel %vm722_vm5, %v733_v37, %v735_v54  ;;  %v765_v1 = vmul.u32 %v763_v14, %v2123_v41 }
 0x107   : > { %v766_v26 = vmul.u32 %v762_v55, %v739_v15  ;;  %v740_v29 = vand.u32 65535, %v736_v45  ;;  %v741_v34 = vshrl.u32 %v736_v45, 16  ;;  %v659_v22 = vsel %vm536_vm0, %v658_v10, %v2114_v52 }
 0x108   : > { %v647_v4 = vor.u32 %v646_v50, %v645_v51  ;;  %v650_v7 = vshll.u32 %v649_v24, 23  ;;  %v725_v3 = vsel %vm721_vm1, %v705_v48, %v708_v6  ;;  %v764_v13 = vmul.u32 %v762_v55, %v2123_v41 }
 0x109   : > { %v768_v60 = vshll.u32 %v765_v1, 16  ;;  %v727_v12 = vsel %vm723_vm4, %v711_v33, %v726_v35  ;;  %v743_v16 = vmul.u32 %v741_v34, %v2123_v41  ;;  %v767_v57 = vmul.u32 %v763_v14, %v739_v15 }
 0x10a   : > { %v651_v9 = vor.u32 4788187, %v650_v7  ;;  %v654_v36 = vcvt.s32.f32 %v647_v4  ;;  %v744_v47 = vmul.u32 %v740_v29, %v739_v15  ;;  %v770_v31 = vshll.u32 %v766_v26, 16 }
 0x10b   : > { %vm772_vm7 = vc.u32 %v764_v13, %v768_v60  ;;  %v742_v52 = vmul.u32 %v740_v29, %v2123_v41  ;;  %v746_v30 = vshll.u32 %v743_v16, 16  ;;  %v745_v28 = vmul.u32 %v741_v34, %v739_v15 }
 0x10c   : > { %v652_v61 = vand.u32 2147483647, %v651_v9  ;;  %v773_v6 = vsel %vm772_vm7, 1, %v1704_v0  ;;  %v748_v59 = vshll.u32 %v744_v47, 16  ;;  %v774_v32 = vadd.s32 %v768_v60, %v764_v13 }
 0x10d   : > { %v775_v46 = vadd.s32 %v773_v6, %v767_v57  ;;  %vm750_vm8 = vc.u32 %v742_v52, %v746_v30  ;;  %v752_v33 = vadd.s32 %v746_v30, %v742_v52  ;;  %v854_v25 = vadd.s32 1, %v2149_v23 }
 0x10e   : > { %v655_v10 = vmul.f32 %v654_v36, %v652_v61  ;;  %v661_v42 = vsel %vm2183_vm6, 0, %v659_v22  ;;  %v728_v63 = vsel %vm722_vm5, %v725_v3, %v727_v12  ;;  %v751_v41 = vsel %vm750_vm8, 1, %v1704_v0 }
 0x10f   : > { %vm776_vm9 = vc.u32 %v774_v32, %v770_v31  ;;  %v753_v37 = vadd.s32 %v751_v41, %v745_v28  ;;  %vm754_vm10 = vc.u32 %v752_v33, %v748_v59  ;;  %v769_v53 = vshrl.u32 %v765_v1, 16 }
 0x110   : > { %v656_v18 = vxor.u32 2147483648, %v655_v10  ;;  %v777_v15 = vsel %vm776_vm9, 1, %v1704_v0  ;;  %v755_v48 = vsel %vm754_vm10, 1, %v1704_v0  ;;  %vm855_vm11 = vcmp.gt.s32.totalorder %v854_v25, 0 }
 0x111   : > { %v779_v55 = vadd.s32 %v777_v15, %v775_v46  ;;  %v747_v14 = vshrl.u32 %v743_v16, 16  ;;  %v757_v51 = vadd.s32 %v755_v48, %v753_v37  ;;  %v856_v43 = vsel %vm855_vm11, %v854_v25, 0 }
 0x112   : > { %v657_v23 = vsel %vm536_vm0, %v656_v18, %v655_v10  ;;  %v771_v24 = vshrl.u32 %v766_v26, 16  ;;  %v858_v35 = vand.u32 31, %v856_v43  ;;  %v678_v4 = vadd.s32 3, %v661_v42 }
 0x113   : > { %v660_v50 = vsel %vm2183_vm6, %v1815_v44, %v657_v23  ;;  %v780_v54 = vadd.s32 %v779_v55, %v769_v53  ;;  %v749_v7 = vshrl.u32 %v744_v47, 16  ;;  %v758_v29 = vadd.s32 %v757_v51, %v747_v14 }
 0x114   : > { %v662_v45 = vmul.f32 %v660_v50, %v660_v50  ;;  %v782_v34 = vmul.u32 %v2111_v49, %v728_v63  ;;  %v852_v22 = vor.u32 8388608, %v2153_v17  ;;  %v2222_v3 = vsub.s32 32, %v858_v35 }
 0x115   : > { %v781_v1 = vadd.s32 %v780_v54, %v771_v24  ;;  %v2224_v9 = vadd.s32 %v758_v29, %v749_v7  ;;  %v2226_v27 = vadd.s32 %v774_v32, %v770_v31  ;;  %v2228_v12 = vshrl.u32 %v856_v43, 5 }
 0x116   : > { %v663_v13 = vmul.f32 -0.001358992, %v662_v45  ;;  %v670_v60 = vmul.f32 -0.00019511016, %v662_v45  ;;  %v861_v16 = vshll.u32 %v1705_v56, %v858_v35  ;;  %v862_v57 = vshrl.u32 %v1706_v58, %v2222_v3 }
 0x117   : > { %v785_v26 = vadd.s32 1, %v781_v1  ;;  %vm784_vm12 = vc.u32 %v2224_v9, %v2226_v27  ;;  %v865_v17 = vshrl.u32 %v1707_v62, %v2222_v3  ;;  %v864_v31 = vshll.u32 %v1706_v58, %v858_v35 }
 0x118   : > { %v664_v36 = vadd.f32 0.041655596, %v663_v13  ;;  %v671_v49 = vadd.f32 0.008332121, %v670_v60  ;;  %v867_v61 = vshll.u32 %v1707_v62, %v858_v35  ;;  %v868_v52 = vshrl.u32 %v1708_v2, %v2222_v3 }
 0x119   : > { %v786_v47 = vsel %vm784_vm12, %v785_v26, %v781_v1  ;;  %v2241_v59 = vor.u32 %v862_v57, %v861_v16  ;;  %v870_v32 = vshll.u32 %v1708_v2, %v858_v35  ;;  %v871_v46 = vshrl.u32 %v1709_v5, %v2222_v3 }
 0x11a   : > { %v665_v30 = vmul.f32 %v664_v36, %v662_v45  ;;  %v672_v6 = vmul.f32 %v671_v49, %v662_v45  ;;  %v787_v28 = vadd.s32 %v786_v47, %v782_v34  ;;  %v873_v10 = vshll.u32 %v1709_v5, %v858_v35 }
 0x11b   : > { %v874_v33 = vshrl.u32 %v1710_v8, %v2222_v3  ;;  %v2249_v41 = vor.u32 %v865_v17, %v864_v31  ;;  %v679_v18 = vand.u32 3, %v678_v4  ;;  %v869_v37 = vor.u32 %v868_v52, %v867_v61 }
 0x11c   : > { %v666_v25 = vadd.f32 -0.4999988, %v665_v30  ;;  %v673_v42 = vadd.f32 -0.16666654, %v672_v6  ;;  %v788_v63 = vadd.s32 536870912, %v787_v28  ;;  %v872_v15 = vor.u32 %v871_v46, %v870_v32 }
 0x11d   : > { %v875_v48 = vor.u32 %v874_v33, %v873_v10  ;;  %vm879_vm13 = vcmp.lt.s32.totalorder %v2228_v12, 4  ;;  %vm876_vm14 = vcmp.lt.s32.totalorder %v2228_v12, 1  ;;  %vm878_vm15 = vcmp.lt.s32.totalorder %v2228_v12, 3 }
 0x11e   : > { %v667_v53 = vmul.f32 %v666_v25, %v662_v45  ;;  %v674_v55 = vmul.f32 %v673_v42, %v662_v45  ;;  %v2251_v23 = vshrl.u32 %v788_v63, 30  ;;  %v885_v14 = vsel %vm879_vm13, %v872_v15, 920167782 }
 0x11f   : > { %v2258_v51 = vshll.u32 %v852_v22, 8  ;;  %v884_v35 = vsel %vm876_vm14, %v2241_v59, %v2249_v41  ;;  %vm680_vm0 = vcmp.lt.s32.totalorder %v679_v18, 2  ;;  %vm877_vm1 = vcmp.lt.s32.totalorder %v2228_v12, 2 }
 0x120   : > { %v668_v43 = vadd.f32 1.0, %v667_v53  ;;  %v675_v24 = vadd.f32 1.0, %v674_v55  ;;  %v790_v54 = vshll.u32 %v2251_v23, 30  ;;  %v886_v45 = vsel %vm878_vm15, %v869_v37, %v885_v14 }
 0x121   : > { %v889_v4 = vsel %vm879_vm13, %v875_v48, 1326507024  ;;  %v888_v34 = vsel %vm876_vm14, %v2249_v41, %v869_v37  ;;  %vm681_vm2 = vcmp.eq.s32.totalorder %v679_v18, 0  ;;  %vm684_vm3 = vcmp.eq.s32.totalorder %v679_v18, 2 }
 0x122   : > { %v676_v7 = vmul.f32 %v675_v24, %v660_v50  ;;  %v685_v29 = vxor.u32 2147483648, %v668_v43  ;;  %v791_v1 = vsub.s32 %v787_v28, %v790_v54  ;;  %v887_v22 = vsel %vm877_vm1, %v884_v35, %v886_v45 }
 0x123   : > { %v890_v13 = vsel %vm878_vm15, %v872_v15, %v889_v4  ;;  %v893_v16 = vand.u32 65535, %v2258_v51  ;;  %v894_v36 = vshrl.u32 %v2258_v51, 16  ;;  %v917_v49 = vand.u32 65535, %v887_v22 }
 0x124   : > { %v682_v60 = vxor.u32 2147483648, %v676_v7  ;;  %vm792_vm4 = vcmp.lt.s32.totalorder %v791_v1, 0  ;;  %v793_v26 = vsub.s32 0, %v791_v1  ;;  %v686_v50 = vsel %vm684_vm3, %v685_v29, %v676_v7 }
 0x125   : > { %v891_v57 = vsel %vm877_vm1, %v888_v34, %v890_v13  ;;  %vm677_vm5 = vweird.f32 %v1815_v44  ;;  %v918_v6 = vshrl.u32 %v887_v22, 16  ;;  %v783_v10 = vadd.s32 %v2226_v27, %v2224_v9 }
 0x126   : > { %v683_v17 = vsel %vm681_vm2, %v668_v43, %v682_v60  ;;  %v794_v47 = vsel %vm792_vm4, %v793_v26, %v791_v1  ;;  %v895_v31 = vand.u32 65535, %v891_v57  ;;  %v896_v61 = vshrl.u32 %v891_v57, 16 }
 0x127   : > { %v687_v52 = vsel %vm680_vm0, %v683_v17, %v686_v50  ;;  %v795_v30 = vclz %v794_v47  ;;  %v860_v25 = vshrl.u32 %v1705_v56, %v2222_v3  ;;  %v881_v42 = vsel %vm879_vm13, %v869_v37, 2102212464 }
 0x128   : > { %v688_v28 = vsel %vm677_vm5, nan, %v687_v52  ;;  %v898_v32 = vmul.u32 %v896_v61, %v893_v16  ;;  %v899_v46 = vmul.u32 %v895_v31, %v894_v36  ;;  %v897_v63 = vmul.u32 %v895_v31, %v893_v16 }
 0x129   : > { %v1568_v33 = vadd.s32 4294967294, %v795_v30  ;;  %1466 = vst [vmem:[%s2108_s8 + $0x10] sm:$0xff] %v688_v28  ;;  %v919_v18 = vmul.u32 %v917_v49, %v893_v16  ;;  %v900_v15 = vmul.u32 %v896_v61, %v894_v36  ;;  %v920_v53 = vmul.u32 %v918_v6, %v893_v16 }
 0x12a   : > { %v901_v44 = vshll.u32 %v898_v32, 16  ;;  %v903_v48 = vshll.u32 %v899_v46, 16  ;;  %vm691_vm7 = vcmp.lt.s32.totalorder %v1809_v38, 0  ;;  %v921_v27 = vmul.u32 %v917_v49, %v894_v36 }
 0x12b   : > { %vm1569_vm6 = vcmp.lt.s32.totalorder %v1568_v33, 0  ;;  %v902_v3 = vshrl.u32 %v898_v32, 16  ;;  %v922_v37 = vmul.u32 %v918_v6, %v894_v36  ;;  %v923_v35 = vshll.u32 %v920_v53, 16 }
 0x12c   : > { %v798_v55 = vsel %vm1569_vm6, 0, %v1568_v33  ;;  %vm905_vm8 = vc.u32 %v897_v63, %v901_v44  ;;  %v907_v9 = vadd.s32 %v901_v44, %v897_v63  ;;  %v925_v22 = vshll.u32 %v921_v27, 16 }
 0x12d   : > { %v799_v14 = vsub.s32 32, %v798_v55  ;;  %v803_v43 = vsub.s32 4294967266, %v798_v55  ;;  %v906_v24 = vsel %vm905_vm8, 1, %v1704_v0  ;;  %v800_v45 = vshll.u32 %v791_v1, %v798_v55 }
 0x12e   : > { %v908_v54 = vadd.s32 %v906_v24, %v900_v15  ;;  %vm909_vm9 = vc.u32 %v907_v9, %v903_v48  ;;  %vm927_vm10 = vc.u32 %v919_v18, %v923_v35  ;;  %v929_v13 = vadd.s32 %v923_v35, %v919_v18 }
 0x12f   : > { %v801_v4 = vshrl.u32 %v783_v10, %v799_v14  ;;  %v804_v7 = vadd.s32 127, %v803_v43  ;;  %v910_v29 = vsel %vm909_vm9, 1, %v1704_v0  ;;  %v813_v16 = vsub.s32 4, %v2251_v23 }
 0x130   : > { %v912_v34 = vadd.s32 %v910_v29, %v908_v54  ;;  %v928_v50 = vsel %vm927_vm10, 1, %v1704_v0  ;;  %vm931_vm11 = vc.u32 %v929_v13, %v925_v22  ;;  %v999_v36 = vand.u32 2147483647, %v1799_v20 }
 0x131   : > { %v802_v60 = vor.u32 %v801_v4, %v800_v45  ;;  %v805_v26 = vshll.u32 %v804_v7, 23  ;;  %v930_v49 = vadd.s32 %v928_v50, %v922_v37  ;;  %v880_v17 = vsel %vm876_vm14, %v860_v25, %v2241_v59 }
 0x132   : > { %v913_v57 = vadd.s32 %v912_v34, %v902_v3  ;;  %v904_v47 = vshrl.u32 %v899_v46, 16  ;;  %v932_v31 = vsel %vm931_vm11, 1, %v1704_v0  ;;  %v882_v61 = vsel %vm878_vm15, %v2249_v41, %v881_v42 }
 0x133   : > { %v806_v1 = vor.u32 4788187, %v805_v26  ;;  %v924_v52 = vshrl.u32 %v920_v53, 16  ;;  %v934_v30 = vadd.s32 %v932_v31, %v930_v49  ;;  %v1002_v6 = vand.u32 2139095040, %v1799_v20 }
 0x134   : > { %v809_v32 = vcvt.s32.f32 %v802_v60  ;;  %v814_v10 = vsel %vm691_vm7, %v813_v16, %v2251_v23  ;;  %v914_v33 = vadd.s32 %v913_v57, %v904_v47  ;;  %v926_v63 = vshrl.u32 %v921_v27, 16 }
 0x135   : > { %v807_v28 = vand.u32 2147483647, %v806_v1  ;;  %v935_v59 = vadd.s32 %v934_v30, %v924_v52  ;;  %v1003_v46 = vshrl.u32 %v1002_v6, 23  ;;  %v1006_v25 = vand.u32 8388607, %v999_v36 }
 0x136   : > { %v933_v18 = vadd.s32 %v929_v13, %v925_v22  ;;  %vm2311_vm12 = vcmp.le.f32.partialorder %v689_v11, 0.7853982  ;;  %v883_v42 = vsel %vm877_vm1, %v880_v17, %v882_v61  ;;  %v1157_v14 = vand.u32 2139095040, %v1811_v39 }
 0x137   : > { %v810_v44 = vmul.f32 %v809_v32, %v807_v28  ;;  %v936_v15 = vadd.s32 %v935_v59, %v926_v63  ;;  %v1573_v23 = vadd.s32 4294967169, %v1003_v46  ;;  %v816_v53 = vsel %vm2311_vm12, 0, %v814_v10 }
 0x138   : > { %vm939_vm13 = vc.u32 %v914_v33, %v933_v18  ;;  %v1007_v9 = vor.u32 8388608, %v1006_v25  ;;  %v937_v43 = vmul.u32 %v2258_v51, %v883_v42  ;;  %v833_v54 = vadd.s32 3, %v816_v53 }
 0x139   : > { %v811_v48 = vxor.u32 2147483648, %v810_v44  ;;  %v940_v55 = vadd.s32 1, %v936_v15  ;;  %v1009_v27 = vadd.s32 1, %v1573_v23  ;;  %v1158_v7 = vshrl.u32 %v1157_v14, 23 }
 0x13a   : > { %v2326_v4 = vshll.u32 %v1007_v9, 8  ;;  %v2330_v26 = vand.u32 3, %v833_v54  ;;  %v2332_v50 = vadd.s32 %v933_v18, %v914_v33  ;;  %v1154_v49 = vand.u32 2147483647, %v1811_v39 }
 0x13b   : > { %v812_v11 = vsel %vm691_vm7, %v811_v48, %v810_v44  ;;  %v941_v3 = vsel %vm939_vm13, %v940_v55, %v936_v15  ;;  %vm1010_vm14 = vcmp.gt.s32.totalorder %v1009_v27, 0  ;;  %v1576_v1 = vadd.s32 4294967169, %v1158_v7 }
 0x13c   : > { %v815_v12 = vsel %vm2311_vm12, %v1809_v38, %v812_v11  ;;  %v942_v37 = vadd.s32 %v941_v3, %v937_v43  ;;  %v1011_v35 = vsel %vm1010_vm14, %v1009_v27, 0  ;;  %v2335_v57 = vand.u32 65535, %v2326_v4 }
 0x13d   : > { %v817_v24 = vmul.f32 %v815_v12, %v815_v12  ;;  %v1013_v45 = vand.u32 31, %v1011_v35  ;;  %vm846_vm15 = vcmp.lt.s32.totalorder %v1797_v19, 0  ;;  %v2339_v61 = vshrl.u32 %v1011_v35, 5 }
 0x13e   : > { %v943_v22 = vadd.s32 536870912, %v942_v37  ;;  %vm839_vm0 = vcmp.eq.s32.totalorder %v2330_v26, 2  ;;  %vm836_vm1 = vcmp.eq.s32.totalorder %v2330_v26, 0  ;;  %vm835_vm2 = vcmp.lt.s32.totalorder %v2330_v26, 2 }
 0x13f   : > { %v818_v29 = vmul.f32 -0.001358992, %v817_v24  ;;  %v825_v34 = vmul.f32 -0.00019511016, %v817_v24  ;;  %v2328_v13 = vsub.s32 32, %v1013_v45  ;;  %v1016_v52 = vshll.u32 %v1705_v56, %v1013_v45 }
 0x140   : > { %v944_v16 = vshrl.u32 %v943_v22, 30  ;;  %v1019_v63 = vshll.u32 %v1706_v58, %v1013_v45  ;;  %v1022_v59 = vshll.u32 %v1707_v62, %v1013_v45  ;;  %v1025_v25 = vshll.u32 %v1708_v2, %v1013_v45 }
 0x141   : > { %v819_v51 = vadd.f32 0.041655596, %v818_v29  ;;  %v826_v60 = vadd.f32 0.008332121, %v825_v34  ;;  %v1017_v30 = vshrl.u32 %v1706_v58, %v2328_v13  ;;  %v1020_v6 = vshrl.u32 %v1707_v62, %v2328_v13 }
 0x142   : > { %v945_v31 = vshll.u32 %v944_v16, 30  ;;  %v1026_v28 = vshrl.u32 %v1709_v5, %v2328_v13  ;;  %v1023_v46 = vshrl.u32 %v1708_v2, %v2328_v13  ;;  %v1029_v44 = vshrl.u32 %v1710_v8, %v2328_v13 }
 0x143   : > { %v820_v17 = vmul.f32 %v819_v51, %v817_v24  ;;  %v827_v47 = vmul.f32 %v826_v60, %v817_v24  ;;  %vm832_vm4 = vweird.f32 %v1809_v38  ;;  %v968_v15 = vsub.s32 4, %v944_v16 }
 0x144   : > { %v2349_v33 = vsub.s32 %v942_v37, %v945_v31  ;;  %v1018_v23 = vor.u32 %v1017_v30, %v1016_v52  ;;  %v1021_v48 = vor.u32 %v1020_v6, %v1019_v63  ;;  %v1027_v53 = vor.u32 %v1026_v28, %v1025_v25 }
 0x145   : > { %v821_v32 = vadd.f32 -0.4999988, %v820_v17  ;;  %v828_v10 = vadd.f32 -0.16666654, %v827_v47  ;;  %v1028_v14 = vshll.u32 %v1709_v5, %v1013_v45  ;;  %v1024_v43 = vor.u32 %v1023_v46, %v1022_v59 }
 0x146   : > { %vm947_vm3 = vcmp.lt.s32.totalorder %v2349_v33, 0  ;;  %v948_v42 = vsub.s32 0, %v2349_v33  ;;  %v1049_v3 = vshrl.u32 %v2326_v4, 16  ;;  %vm2370_vm5 = vcmp.le.f32.partialorder %v844_v21, 0.7853982 }
 0x147   : > { %v822_v18 = vmul.f32 %v821_v32, %v817_v24  ;;  %v829_v41 = vmul.f32 %v828_v10, %v817_v24  ;;  %v2366_v24 = vadd.s32 1, %v1576_v1  ;;  %v1030_v7 = vor.u32 %v1029_v44, %v1028_v14 }
 0x148   : > { %v949_v27 = vsel %vm947_vm3, %v948_v42, %v2349_v33  ;;  %vm1031_vm6 = vcmp.lt.s32.totalorder %v2339_v61, 1  ;;  %v2377_v45 = vsel %vm846_vm15, %v968_v15, %v944_v16  ;;  %vm1034_vm7 = vcmp.lt.s32.totalorder %v2339_v61, 4 }
 0x149   : > { %v823_v55 = vadd.f32 1.0, %v822_v18  ;;  %v830_v9 = vadd.f32 1.0, %v829_v41  ;;  %v950_v11 = vclz %v949_v27  ;;  %vm1032_vm8 = vcmp.lt.s32.totalorder %v2339_v61, 2 }
 0x14a   : > { %vm1033_vm9 = vcmp.lt.s32.totalorder %v2339_v61, 3  ;;  %v1040_v21 = vsel %vm1034_vm7, %v1027_v53, 920167782  ;;  %v1043_v60 = vsel %vm1031_vm6, %v1021_v48, %v1024_v43  ;;  %v1044_v47 = vsel %vm1034_vm7, %v1030_v7, 1326507024 }
 0x14b   : > { %v831_v54 = vmul.f32 %v830_v9, %v815_v12  ;;  %v840_v37 = vxor.u32 2147483648, %v823_v55  ;;  %v1571_v29 = vadd.s32 4294967294, %v950_v11  ;;  %v1039_v12 = vsel %vm1031_vm6, %v1018_v23, %v1021_v48 }
 0x14c   : > { %v1041_v51 = vsel %vm1033_vm9, %v1024_v43, %v1040_v21  ;;  %v1036_v6 = vsel %vm1034_vm7, %v1024_v43, 2102212464  ;;  %v1045_v32 = vsel %vm1033_vm9, %v1027_v53, %v1044_v47  ;;  %v1015_v44 = vshrl.u32 %v1705_v56, %v2328_v13 }
 0x14d   : > { %v837_v34 = vxor.u32 2147483648, %v831_v54  ;;  %v841_v22 = vsel %vm839_vm0, %v840_v37, %v831_v54  ;;  %vm1572_vm10 = vcmp.lt.s32.totalorder %v1571_v29, 0  ;;  %v1042_v17 = vsel %vm1032_vm8, %v1039_v12, %v1041_v51 }
 0x14e   : > { %v953_v1 = vsel %vm1572_vm10, 0, %v1571_v29  ;;  %v1072_v10 = vand.u32 65535, %v1042_v17  ;;  %v1073_v63 = vshrl.u32 %v1042_v17, 16  ;;  %v1046_v26 = vsel %vm1032_vm8, %v1043_v60, %v1045_v32 }
 0x14f   : > { %v838_v16 = vsel %vm836_vm1, %v823_v55, %v837_v34  ;;  %v954_v52 = vsub.s32 32, %v953_v1  ;;  %v958_v30 = vsub.s32 4294967266, %v953_v1  ;;  %v955_v59 = vshll.u32 %v2349_v33, %v953_v1 }
 0x150   : > { %v842_v31 = vsel %vm835_vm2, %v838_v16, %v841_v22  ;;  %v1050_v18 = vand.u32 65535, %v1046_v26  ;;  %v1051_v38 = vshrl.u32 %v1046_v26, 16  ;;  %v1075_v41 = vmul.u32 %v1073_v63, %v2335_v57 }
 0x151   : > { %v843_v28 = vsel %vm832_vm4, nan, %v842_v31  ;;  %v956_v46 = vshrl.u32 %v2332_v50, %v954_v52  ;;  %v959_v25 = vadd.s32 127, %v958_v30  ;;  %v971_v33 = vsel %vm2370_vm5, 0, %v2377_v45 }
 0x152   : > { %1467 = vst [vmem:[%s2108_s8 + $0x18] sm:$0xff] %v843_v28  ;;  %v1076_v53 = vmul.u32 %v1072_v10, %v1049_v3  ;;  %v1035_v50 = vsel %vm1031_vm6, %v1015_v44, %v1018_v23  ;;  %v1037_v55 = vsel %vm1033_vm9, %v1021_v48, %v1036_v6  ;;  %v1053_v9 = vmul.u32 %v1051_v38, %v2335_v57 }
 0x153   : > { %v957_v42 = vor.u32 %v956_v46, %v955_v59  ;;  %v960_v15 = vshll.u32 %v959_v25, 23  ;;  %v1054_v13 = vmul.u32 %v1050_v18, %v1049_v3  ;;  %v1074_v14 = vmul.u32 %v1072_v10, %v2335_v57 }
 0x154   : > { %v1077_v11 = vmul.u32 %v1073_v63, %v1049_v3  ;;  %v1078_v43 = vshll.u32 %v1075_v41, 16  ;;  %v1052_v37 = vmul.u32 %v1050_v18, %v2335_v57  ;;  %v1055_v7 = vmul.u32 %v1051_v38, %v1049_v3 }
 0x155   : > { %v961_v27 = vor.u32 4788187, %v960_v15  ;;  %v964_v54 = vcvt.s32.f32 %v957_v42  ;;  %v1056_v29 = vshll.u32 %v1053_v9, 16  ;;  %v1058_v12 = vshll.u32 %v1054_v13, 16 }
 0x156   : > { %v1080_v34 = vshll.u32 %v1076_v53, 16  ;;  %vm1082_vm11 = vc.u32 %v1074_v14, %v1078_v43  ;;  %v1084_v21 = vadd.s32 %v1078_v43, %v1074_v14  ;;  %vm1165_vm13 = vcmp.gt.s32.totalorder %v2366_v24, 0 }
 0x157   : > { %v962_v45 = vand.u32 2147483647, %v961_v27  ;;  %vm1060_vm12 = vc.u32 %v1052_v37, %v1056_v29  ;;  %v1062_v23 = vadd.s32 %v1056_v29, %v1052_v37  ;;  %v1083_v48 = vsel %vm1082_vm11, 1, %v1704_v0 }
 0x158   : > { %v1061_v51 = vsel %vm1060_vm12, 1, %v1704_v0  ;;  %v1085_v60 = vadd.s32 %v1083_v48, %v1077_v11  ;;  %v1079_v57 = vshrl.u32 %v1075_v41, 16  ;;  %vm1086_vm0 = vc.u32 %v1084_v21, %v1080_v34 }
 0x159   : > { %v965_v22 = vmul.f32 %v964_v54, %v962_v45  ;;  %v1063_v16 = vadd.s32 %v1061_v51, %v1055_v7  ;;  %vm1064_vm14 = vc.u32 %v1062_v23, %v1058_v12  ;;  %v1087_v17 = vsel %vm1086_vm0, 1, %v1704_v0 }
 0x15a   : > { %v1065_v1 = vsel %vm1064_vm14, 1, %v1704_v0  ;;  %v1166_v47 = vsel %vm1165_vm13, %v2366_v24, 0  ;;  %v1057_v31 = vshrl.u32 %v1053_v9, 16  ;;  %v1089_v30 = vadd.s32 %v1087_v17, %v1085_v60 }
 0x15b   : > { %v966_v3 = vxor.u32 2147483648, %v965_v22  ;;  %v1067_v52 = vadd.s32 %v1065_v1, %v1063_v16  ;;  %v1168_v6 = vand.u32 31, %v1166_v47  ;;  %v1038_v32 = vsel %vm1032_vm8, %v1035_v50, %v1037_v55 }
 0x15c   : > { %v1059_v10 = vshrl.u32 %v1054_v13, 16  ;;  %v1081_v63 = vshrl.u32 %v1076_v53, 16  ;;  %v1090_v25 = vadd.s32 %v1089_v30, %v1079_v57  ;;  %v988_v44 = vadd.s32 3, %v971_v33 }
 0x15d   : > { %v967_v28 = vsel %vm846_vm15, %v966_v3, %v965_v22  ;;  %v1068_v46 = vadd.s32 %v1067_v52, %v1057_v31  ;;  %v2437_v26 = vsub.s32 32, %v1168_v6  ;;  %v1161_v18 = vand.u32 8388607, %v1154_v49 }
 0x15e   : > { %v970_v59 = vsel %vm2370_vm5, %v1797_v19, %v967_v28  ;;  %v2443_v41 = vadd.s32 %v1084_v21, %v1080_v34  ;;  %v1091_v61 = vadd.s32 %v1090_v25, %v1081_v63  ;;  %v1092_v42 = vmul.u32 %v2326_v4, %v1038_v32 }
 0x15f   : > { %v972_v24 = vmul.f32 %v970_v59, %v970_v59  ;;  %v2441_v38 = vadd.s32 %v1068_v46, %v1059_v10  ;;  %v2446_v35 = vshrl.u32 %v1166_v47, 5  ;;  %v1174_v50 = vshll.u32 %v1706_v58, %v1168_v6 }
 0x160   : > { %v1095_v33 = vadd.s32 1, %v1091_v61  ;;  %v1175_v55 = vshrl.u32 %v1707_v62, %v2437_v26  ;;  %v1178_v9 = vshrl.u32 %v1708_v2, %v2437_v26  ;;  %v1172_v4 = vshrl.u32 %v1706_v58, %v2437_v26 }
 0x161   : > { %v973_v15 = vmul.f32 -0.001358992, %v972_v24  ;;  %v980_v53 = vmul.f32 -0.00019511016, %v972_v24  ;;  %vm1094_vm15 = vc.u32 %v2441_v38, %v2443_v41  ;;  %v1177_v14 = vshll.u32 %v1707_v62, %v1168_v6 }
 0x162   : > { %v1096_v11 = vsel %vm1094_vm15, %v1095_v33, %v1091_v61  ;;  %v1180_v43 = vshll.u32 %v1708_v2, %v1168_v6  ;;  %v1181_v54 = vshrl.u32 %v1709_v5, %v2437_v26  ;;  %v1183_v37 = vshll.u32 %v1709_v5, %v1168_v6 }
 0x163   : > { %v974_v13 = vadd.f32 0.041655596, %v973_v15  ;;  %v981_v27 = vadd.f32 0.008332121, %v980_v53  ;;  %v1097_v45 = vadd.s32 %v1096_v11, %v1092_v42  ;;  %v1184_v12 = vshrl.u32 %v1710_v8, %v2437_v26 }
 0x164   : > { %v1171_v34 = vshll.u32 %v1705_v56, %v1168_v6  ;;  %v2465_v23 = vor.u32 %v1175_v55, %v1174_v50  ;;  %v2467_v48 = vor.u32 %v1178_v9, %v1177_v14  ;;  %v1182_v21 = vor.u32 %v1181_v54, %v1180_v43 }
 0x165   : > { %v975_v7 = vmul.f32 %v974_v13, %v972_v24  ;;  %v982_v29 = vmul.f32 %v981_v27, %v972_v24  ;;  %v1098_v60 = vadd.s32 536870912, %v1097_v45  ;;  %v1185_v16 = vor.u32 %v1184_v12, %v1183_v37 }
 0x166   : > { %v989_v57 = vand.u32 3, %v988_v44  ;;  %v1162_v3 = vor.u32 8388608, %v1161_v18  ;;  %v2469_v1 = vor.u32 %v1172_v4, %v1171_v34  ;;  %vm1189_vm1 = vcmp.lt.s32.totalorder %v2446_v35, 4 }
 0x167   : > { %v976_v22 = vadd.f32 -0.4999988, %v975_v7  ;;  %v983_v51 = vadd.f32 -0.16666654, %v982_v29  ;;  %v2471_v31 = vshrl.u32 %v1098_v60, 30  ;;  %vm1186_vm2 = vcmp.lt.s32.totalorder %v2446_v35, 1 }
 0x168   : > { %vm1188_vm3 = vcmp.lt.s32.totalorder %v2446_v35, 3  ;;  %v1195_v52 = vsel %vm1189_vm1, %v1182_v21, 920167782  ;;  %v1199_v30 = vsel %vm1189_vm1, %v1185_v16, 1326507024  ;;  %v1198_v10 = vsel %vm1186_vm2, %v2465_v23, %v2467_v48 }
 0x169   : > { %v977_v17 = vmul.f32 %v976_v22, %v972_v24  ;;  %v984_v47 = vmul.f32 %v983_v51, %v972_v24  ;;  %v1100_v32 = vshll.u32 %v2471_v31, 30  ;;  %v1194_v63 = vsel %vm1186_vm2, %v2469_v1, %v2465_v23 }
 0x16a   : > { %v1196_v46 = vsel %vm1188_vm3, %v2467_v48, %v1195_v52  ;;  %v1200_v25 = vsel %vm1188_vm3, %v1182_v21, %v1199_v30  ;;  %v2494_v24 = vshll.u32 %v1162_v3, 8  ;;  %vm1187_vm4 = vcmp.lt.s32.totalorder %v2446_v35, 2 }
 0x16b   : > { %v978_v6 = vadd.f32 1.0, %v977_v17  ;;  %v985_v28 = vadd.f32 1.0, %v984_v47  ;;  %v1101_v61 = vsub.s32 %v1097_v45, %v1100_v32  ;;  %vm990_vm5 = vcmp.lt.s32.totalorder %v989_v57, 2 }
 0x16c   : > { %vm991_vm6 = vcmp.eq.s32.totalorder %v989_v57, 0  ;;  %v1201_v42 = vsel %vm1187_vm4, %v1198_v10, %v1200_v25  ;;  %v1197_v50 = vsel %vm1187_vm4, %v1194_v63, %v1196_v46  ;;  %vm994_vm8 = vcmp.eq.s32.totalorder %v989_v57, 2 }
 0x16d   : > { %v986_v44 = vmul.f32 %v985_v28, %v970_v59  ;;  %v995_v18 = vxor.u32 2147483648, %v978_v6  ;;  %vm1102_vm7 = vcmp.lt.s32.totalorder %v1101_v61, 0  ;;  %v1103_v53 = vsub.s32 0, %v1101_v61 }
 0x16e   : > { %v1203_v33 = vand.u32 65535, %v2494_v24  ;;  %v1205_v55 = vand.u32 65535, %v1201_v42  ;;  %v1206_v59 = vshrl.u32 %v1201_v42, 16  ;;  %v1204_v4 = vshrl.u32 %v2494_v24, 16 }
 0x16f   : > { %v992_v15 = vxor.u32 2147483648, %v986_v44  ;;  %v996_v13 = vsel %vm994_vm8, %v995_v18, %v986_v44  ;;  %v1104_v27 = vsel %vm1102_vm7, %v1103_v53, %v1101_v61  ;;  %vm987_vm9 = vweird.f32 %v1797_v19 }
 0x170   : > { %v1105_v11 = vclz %v1104_v27  ;;  %v1228_v43 = vshrl.u32 %v1197_v50, 16  ;;  %v1208_v37 = vmul.u32 %v1206_v59, %v1203_v33  ;;  %v1209_v7 = vmul.u32 %v1205_v55, %v1204_v4 }
 0x171   : > { %v993_v9 = vsel %vm991_vm6, %v978_v6, %v992_v15  ;;  %v1227_v29 = vand.u32 65535, %v1197_v50  ;;  %v1170_v12 = vshrl.u32 %v1705_v56, %v2437_v26  ;;  %v1093_v34 = vadd.s32 %v2443_v41, %v2441_v38 }
 0x172   : > { %v997_v14 = vsel %vm990_vm5, %v993_v9, %v996_v13  ;;  %v1574_v45 = vadd.s32 4294967294, %v1105_v11  ;;  %v1207_v21 = vmul.u32 %v1205_v55, %v1203_v33  ;;  %v1210_v22 = vmul.u32 %v1206_v59, %v1204_v4 }
 0x173   : > { %v998_v54 = vsel %vm987_vm9, nan, %v997_v14  ;;  %v1211_v51 = vshll.u32 %v1208_v37, 16  ;;  %v1212_v19 = vshrl.u32 %v1208_v37, 16  ;;  %v1213_v60 = vshll.u32 %v1209_v7, 16 }
 0x174   : > { %1468 = vst [vmem:[%s2108_s8 + $0x20] sm:$0xff] %v998_v54  ;;  %vm1575_vm10 = vcmp.lt.s32.totalorder %v1574_v45, 0  ;;  %v1230_v16 = vmul.u32 %v1228_v43, %v1203_v33  ;;  %v1231_v17 = vmul.u32 %v1227_v29, %v1204_v4  ;;  %vm1001_vm12 = vcmp.lt.s32.totalorder %v1799_v20, 0 }
 0x175   : > { %v1108_v57 = vsel %vm1575_vm10, 0, %v1574_v45  ;;  %vm1215_vm11 = vc.u32 %v1207_v21, %v1211_v51  ;;  %v1217_v3 = vadd.s32 %v1211_v51, %v1207_v21  ;;  %v1229_v30 = vmul.u32 %v1227_v29, %v1203_v33 }
 0x176   : > { %v1109_v47 = vsub.s32 32, %v1108_v57  ;;  %v1113_v52 = vsub.s32 4294967266, %v1108_v57  ;;  %v1216_v26 = vsel %vm1215_vm11, 1, %v1704_v0  ;;  %v1232_v38 = vmul.u32 %v1228_v43, %v1204_v4 }
 0x177   : > { %v1218_v6 = vadd.s32 %v1216_v26, %v1210_v22  ;;  %vm1219_vm13 = vc.u32 %v1217_v3, %v1213_v60  ;;  %v1233_v41 = vshll.u32 %v1230_v16, 16  ;;  %v1110_v28 = vshll.u32 %v1101_v61, %v1108_v57 }
 0x178   : > { %v1111_v32 = vshrl.u32 %v1093_v34, %v1109_v47  ;;  %v1114_v10 = vadd.s32 127, %v1113_v52  ;;  %v1220_v63 = vsel %vm1219_vm13, 1, %v1704_v0  ;;  %v1235_v25 = vshll.u32 %v1231_v17, 16 }
 0x179   : > { %v1222_v46 = vadd.s32 %v1220_v63, %v1218_v6  ;;  %vm1237_vm14 = vc.u32 %v1229_v30, %v1233_v41  ;;  %v1239_v44 = vadd.s32 %v1233_v41, %v1229_v30  ;;  %v1191_v15 = vsel %vm1189_vm1, %v2467_v48, 2102212464 }
 0x17a   : > { %v1112_v18 = vor.u32 %v1111_v32, %v1110_v28  ;;  %v1115_v42 = vshll.u32 %v1114_v10, 23  ;;  %v1238_v53 = vsel %vm1237_vm14, 1, %v1704_v0  ;;  %v1123_v50 = vsub.s32 4, %v2471_v31 }
 0x17b   : > { %v1223_v33 = vadd.s32 %v1222_v46, %v1212_v19  ;;  %v1240_v61 = vadd.s32 %v1238_v53, %v1232_v38  ;;  %vm1241_vm0 = vc.u32 %v1239_v44, %v1235_v25  ;;  %v1214_v59 = vshrl.u32 %v1209_v7, 16 }
 0x17c   : > { %v1116_v55 = vor.u32 4788187, %v1115_v42  ;;  %v1242_v9 = vsel %vm1241_vm0, 1, %v1704_v0  ;;  %v1312_v13 = vand.u32 2139095040, %v1813_v40  ;;  %v1190_v27 = vsel %vm1186_vm2, %v1170_v12, %v2469_v1 }
 0x17d   : > { %v1192_v48 = vsel %vm1188_vm3, %v2465_v23, %v1191_v15  ;;  %v1234_v4 = vshrl.u32 %v1230_v16, 16  ;;  %v1244_v14 = vadd.s32 %v1242_v9, %v1240_v61  ;;  %v1119_v43 = vcvt.s32.f32 %v1112_v18 }
 0x17e   : > { %v1117_v11 = vand.u32 2147483647, %v1116_v55  ;;  %v2526_v54 = vadd.s32 %v1223_v33, %v1214_v59  ;;  %v1313_v37 = vshrl.u32 %v1312_v13, 23  ;;  %v1124_v7 = vsel %vm1001_vm12, %v1123_v50, %v2471_v31 }
 0x17f   : > { %v1236_v29 = vshrl.u32 %v1231_v17, 16  ;;  %v1245_v45 = vadd.s32 %v1244_v14, %v1234_v4  ;;  %v2531_v21 = vadd.s32 %v1239_v44, %v1235_v25  ;;  %v1309_v1 = vand.u32 2147483647, %v1813_v40 }
 0x180   : > { %v1120_v34 = vmul.f32 %v1119_v43, %v1117_v11  ;;  %v1579_v12 = vadd.s32 4294967169, %v1313_v37  ;;  %vm1000_vm15 = vcmp.le.f32.partialorder %v999_v36, 0.7853982  ;;  %v1193_v23 = vsel %vm1187_vm4, %v1190_v27, %v1192_v48 }
 0x181   : > { %v1246_v22 = vadd.s32 %v1245_v45, %v1236_v29  ;;  %v1126_v19 = vsel %vm1000_vm15, 0, %v1124_v7  ;;  %vm1249_vm1 = vc.u32 %v2526_v54, %v2531_v21  ;;  %v1247_v57 = vmul.u32 %v2494_v24, %v1193_v23 }
 0x182   : > { %v1121_v51 = vxor.u32 2147483648, %v1120_v34  ;;  %v1319_v31 = vadd.s32 1, %v1579_v12  ;;  %v1316_v3 = vand.u32 8388607, %v1309_v1  ;;  %v1143_v35 = vadd.s32 3, %v1126_v19 }
 0x183   : > { %v1250_v60 = vadd.s32 1, %v1246_v22  ;;  %vm1142_vm7 = vweird.f32 %v1799_v20  ;;  %v1248_v12 = vadd.s32 %v2531_v21, %v2526_v54  ;;  %vm2622_vm13 = vcmp.le.f32.partialorder %v1154_v49, 0.7853982 }
 0x184   : > { %v1122_v16 = vsel %vm1001_vm12, %v1121_v51, %v1120_v34  ;;  %vm1320_vm2 = vcmp.gt.s32.totalorder %v1319_v31, 0  ;;  %v1317_v28 = vor.u32 8388608, %v1316_v3  ;;  %v2546_v32 = vand.u32 3, %v1143_v35 }
 0x185   : > { %v1125_v36 = vsel %vm1000_vm15, %v1799_v20, %v1122_v16  ;;  %v1251_v17 = vsel %vm1249_vm1, %v1250_v60, %v1246_v22  ;;  %v1321_v47 = vsel %vm1320_vm2, %v1319_v31, 0  ;;  %vm1156_vm2 = vcmp.lt.s32.totalorder %v1811_v39, 0 }
 0x186   : > { %v1127_v52 = vmul.f32 %v1125_v36, %v1125_v36  ;;  %v1252_v26 = vadd.s32 %v1251_v17, %v1247_v57  ;;  %v1323_v30 = vand.u32 31, %v1321_v47  ;;  %v2553_v42 = vshll.u32 %v1317_v28, 8 }
 0x187   : > { %vm1149_vm3 = vcmp.eq.s32.totalorder %v2546_v32, 2  ;;  %v2556_v15 = vshrl.u32 %v1321_v47, 5  ;;  %vm1146_vm4 = vcmp.eq.s32.totalorder %v2546_v32, 0  ;;  %vm1145_vm5 = vcmp.lt.s32.totalorder %v2546_v32, 2 }
 0x188   : > { %v1128_v6 = vmul.f32 -0.001358992, %v1127_v52  ;;  %v1135_v38 = vmul.f32 -0.00019511016, %v1127_v52  ;;  %v1253_v41 = vadd.s32 536870912, %v1252_v26  ;;  %v2548_v10 = vsub.s32 32, %v1323_v30 }
 0x189   : > { %v1326_v53 = vshll.u32 %v1705_v56, %v1323_v30  ;;  %v1329_v13 = vshll.u32 %v1706_v58, %v1323_v30  ;;  %v1335_v48 = vshll.u32 %v1708_v2, %v1323_v30  ;;  %v1338_v29 = vshll.u32 %v1709_v5, %v1323_v30 }
 0x18a   : > { %v1129_v24 = vadd.f32 0.041655596, %v1128_v6  ;;  %v1136_v63 = vadd.f32 0.008332121, %v1135_v38  ;;  %v2550_v46 = vshrl.u32 %v1253_v41, 30  ;;  %v1327_v50 = vshrl.u32 %v1706_v58, %v2548_v10 }
 0x18b   : > { %v1330_v33 = vshrl.u32 %v1707_v62, %v2548_v10  ;;  %v1336_v9 = vshrl.u32 %v1709_v5, %v2548_v10  ;;  %v1333_v27 = vshrl.u32 %v1708_v2, %v2548_v10  ;;  %v1339_v4 = vshrl.u32 %v1710_v8, %v2548_v10 }
 0x18c   : > { %v1130_v25 = vmul.f32 %v1129_v24, %v1127_v52  ;;  %v1137_v44 = vmul.f32 %v1136_v63, %v1127_v52  ;;  %v1255_v18 = vshll.u32 %v2550_v46, 30  ;;  %v2574_v37 = vor.u32 %v1327_v50, %v1326_v53 }
 0x18d   : > { %v2576_v7 = vor.u32 %v1330_v33, %v1329_v13  ;;  %v1332_v58 = vshll.u32 %v1707_v62, %v1323_v30  ;;  %v1337_v8 = vor.u32 %v1336_v9, %v1335_v48  ;;  %v1340_v51 = vor.u32 %v1339_v4, %v1338_v29 }
 0x18e   : > { %v1131_v61 = vadd.f32 -0.4999988, %v1130_v25  ;;  %v1138_v55 = vadd.f32 -0.16666654, %v1137_v44  ;;  %v1256_v59 = vsub.s32 %v1252_v26, %v1255_v18  ;;  %vm1341_vm8 = vcmp.lt.s32.totalorder %v2556_v15, 1 }
 0x18f   : > { %v2582_v22 = vor.u32 %v1333_v27, %v1332_v58  ;;  %v1358_v60 = vand.u32 65535, %v2553_v42  ;;  %vm1342_vm9 = vcmp.lt.s32.totalorder %v2556_v15, 2  ;;  %vm1344_vm10 = vcmp.lt.s32.totalorder %v2556_v15, 4 }
 0x190   : > { %v1132_v14 = vmul.f32 %v1131_v61, %v1127_v52  ;;  %v1139_v11 = vmul.f32 %v1138_v55, %v1127_v52  ;;  %vm1257_vm6 = vcmp.lt.s32.totalorder %v1256_v59, 0  ;;  %v1258_v43 = vsub.s32 0, %v1256_v59 }
 0x191   : > { %v1349_v5 = vsel %vm1341_vm8, %v2574_v37, %v2576_v7  ;;  %vm1343_vm11 = vcmp.lt.s32.totalorder %v2556_v15, 3  ;;  %v1350_v16 = vsel %vm1344_vm10, %v1337_v8, 920167782  ;;  %v1353_v3 = vsel %vm1341_vm8, %v2576_v7, %v2582_v22 }
 0x192   : > { %v1133_v2 = vadd.f32 1.0, %v1132_v14  ;;  %v1140_v45 = vadd.f32 1.0, %v1139_v11  ;;  %v1259_v34 = vsel %vm1257_vm6, %v1258_v43, %v1256_v59  ;;  %v1351_v57 = vsel %vm1343_vm11, %v2582_v22, %v1350_v16 }
 0x193   : > { %v1260_v23 = vclz %v1259_v34  ;;  %v1352_v47 = vsel %vm1342_vm9, %v1349_v5, %v1351_v57  ;;  %v1359_v50 = vshrl.u32 %v2553_v42, 16 }
 0x194   : > { %v1141_v19 = vmul.f32 %v1140_v45, %v1125_v36  ;;  %v1150_v31 = vxor.u32 2147483648, %v1133_v2  ;;  %v1354_v36 = vsel %vm1344_vm10, %v1340_v51, 1326507024  ;;  %v1382_v24 = vand.u32 65535, %v1352_v47 }
 0x195   : > { %v1577_v62 = vadd.s32 4294967294, %v1260_v23  ;;  %v1355_v52 = vsel %vm1343_vm11, %v1337_v8, %v1354_v36  ;;  %v1383_v63 = vshrl.u32 %v1352_v47, 16 }
 0x196   : > { %v1147_v54 = vxor.u32 2147483648, %v1141_v19  ;;  %v1151_v21 = vsel %vm1149_vm3, %v1150_v31, %v1141_v19  ;;  %v1356_v28 = vsel %vm1342_vm9, %v1353_v3, %v1355_v52  ;;  %v1386_v9 = vmul.u32 %v1382_v24, %v1359_v50 }
 0x197   : > { %vm1578_vm12 = vcmp.lt.s32.totalorder %v1577_v62, 0  ;;  %v1360_v18 = vand.u32 65535, %v1356_v28  ;;  %v1361_v53 = vshrl.u32 %v1356_v28, 16  ;;  %v1385_v32 = vmul.u32 %v1383_v63, %v1358_v60 }
 0x198   : > { %v1148_v35 = vsel %vm1146_vm4, %v1133_v2, %v1147_v54  ;;  %v1263_v17 = vsel %vm1578_vm12, 0, %v1577_v62  ;;  %v1384_v14 = vmul.u32 %v1382_v24, %v1358_v60  ;;  %v1387_v29 = vmul.u32 %v1383_v63, %v1359_v50 }
 0x199   : > { %v1152_v26 = vsel %vm1145_vm5, %v1148_v35, %v1151_v21  ;;  %v1264_v30 = vsub.s32 32, %v1263_v17  ;;  %v1265_v6 = vshll.u32 %v1256_v59, %v1263_v17  ;;  %v1268_v38 = vsub.s32 4294967266, %v1263_v17 }
 0x19a   : > { %v1153_v41 = vsel %vm1142_vm7, nan, %v1152_v26  ;;  %v1363_v55 = vmul.u32 %v1361_v53, %v1358_v60  ;;  %v1364_v59 = vmul.u32 %v1360_v18, %v1359_v50  ;;  %v1388_v20 = vshll.u32 %v1385_v32, 16 }
 0x19b   : > { %v1266_v25 = vshrl.u32 %v1248_v12, %v1264_v30  ;;  %v1269_v44 = vadd.s32 127, %v1268_v38  ;;  %1469 = vst [vmem:[%s2108_s8 + $0x28] sm:$0xff] %v1153_v41  ;;  %v1362_v48 = vmul.u32 %v1360_v18, %v1358_v60  ;;  %v1365_v43 = vmul.u32 %v1361_v53, %v1359_v50 }
 0x19c   : > { %v1366_v4 = vshll.u32 %v1363_v55, 16  ;;  %v1368_v58 = vshll.u32 %v1364_v59, 16  ;;  %vm1392_vm0 = vc.u32 %v1384_v14, %v1388_v20  ;;  %v1390_v8 = vshll.u32 %v1386_v9, 16 }
 0x19d   : > { %v1267_v33 = vor.u32 %v1266_v25, %v1265_v6  ;;  %v1270_v61 = vshll.u32 %v1269_v44, 23  ;;  %v1393_v49 = vsel %vm1392_vm0, 1, %v1704_v0  ;;  %v1394_v12 = vadd.s32 %v1388_v20, %v1384_v14 }
 0x19e   : > { %vm1370_vm14 = vc.u32 %v1362_v48, %v1366_v4  ;;  %v1372_v45 = vadd.s32 %v1366_v4, %v1362_v48  ;;  %v1395_v19 = vadd.s32 %v1393_v49, %v1387_v29  ;;  %v1325_v31 = vshrl.u32 %v1705_v56, %v2548_v10 }
 0x19f   : > { %v1271_v27 = vor.u32 4788187, %v1270_v61  ;;  %v1274_v11 = vcvt.s32.f32 %v1267_v33  ;;  %v1371_v34 = vsel %vm1370_vm14, 1, %v1704_v0  ;;  %v1346_v60 = vsel %vm1344_vm10, %v2582_v22, 2102212464 }
 0x1a0   : > { %v1373_v51 = vadd.s32 %v1371_v34, %v1365_v43  ;;  %vm1374_vm15 = vc.u32 %v1372_v45, %v1368_v58  ;;  %vm1396_vm1 = vc.u32 %v1394_v12, %v1390_v8  ;;  %v1367_v54 = vshrl.u32 %v1363_v55, 16 }
 0x1a1   : > { %v1272_v2 = vand.u32 2147483647, %v1271_v27  ;;  %v1375_v62 = vsel %vm1374_vm15, 1, %v1704_v0  ;;  %v1397_v16 = vsel %vm1396_vm1, 1, %v1704_v0  ;;  %v1345_v57 = vsel %vm1341_vm8, %v1325_v31, %v2574_v37 }
 0x1a2   : > { %v1377_v21 = vadd.s32 %v1375_v62, %v1373_v51  ;;  %v1389_v3 = vshrl.u32 %v1385_v32, 16  ;;  %v1399_v56 = vadd.s32 %v1397_v16, %v1395_v19  ;;  %v1347_v22 = vsel %vm1343_vm11, %v2576_v7, %v1346_v60 }
 0x1a3   : > { %v1275_v23 = vmul.f32 %v1274_v11, %v1272_v2  ;;  %v1369_v36 = vshrl.u32 %v1364_v59, 16  ;;  %v1278_v17 = vsub.s32 4, %v2550_v46  ;;  %v1391_v47 = vshrl.u32 %v1386_v9, 16 }
 0x1a4   : > { %v1378_v35 = vadd.s32 %v1377_v21, %v1367_v54  ;;  %v1400_v52 = vadd.s32 %v1399_v56, %v1389_v3  ;;  %v1398_v30 = vadd.s32 %v1394_v12, %v1390_v8  ;;  %v1348_v6 = vsel %vm1342_vm9, %v1345_v57, %v1347_v22 }
 0x1a5   : > { %v1276_v5 = vxor.u32 2147483648, %v1275_v23  ;;  %v1279_v7 = vsel %vm1156_vm2, %v1278_v17, %v2550_v46  ;;  %v1402_v44 = vmul.u32 %v2553_v42, %v1348_v6  ;;  %vm1297_vm8 = vweird.f32 %v1811_v39 }
 0x1a6   : > { %v1379_v26 = vadd.s32 %v1378_v35, %v1369_v36  ;;  %v1401_v38 = vadd.s32 %v1400_v52, %v1391_v47  ;;  %v1281_v53 = vsel %vm2622_vm13, 0, %v1279_v7  ;;  %vm1311_vm10 = vcmp.lt.s32.totalorder %v1813_v40, 0 }
 0x1a7   : > { %v1277_v10 = vsel %vm1156_vm2, %v1276_v5, %v1275_v23  ;;  %v1298_v59 = vadd.s32 3, %v1281_v53  ;;  %vm1310_vm11 = vcmp.le.f32.partialorder %v1309_v1, 0.7853982  ;;  %vm1452_vm0 = vweird.f32 %v1813_v40 }
 0x1a8   : > { %v1280_v0 = vsel %vm2622_vm13, %v1811_v39, %v1277_v10  ;;  %vm1404_vm3 = vc.u32 %v1379_v26, %v1398_v30  ;;  %v1405_v24 = vadd.s32 1, %v1401_v38  ;;  %v1403_v51 = vadd.s32 %v1398_v30, %v1379_v26 }
 0x1a9   : > { %v1282_v37 = vmul.f32 %v1280_v0, %v1280_v0  ;;  %v1299_v14 = vand.u32 3, %v1298_v59 }
 0x1aa   : > { %v1406_v18 = vsel %vm1404_vm3, %v1405_v24, %v1401_v38 }
 0x1ab   : > { %v1283_v41 = vmul.f32 -0.001358992, %v1282_v37  ;;  %v1290_v28 = vmul.f32 -0.00019511016, %v1282_v37  ;;  %v1407_v32 = vadd.s32 %v1406_v18, %v1402_v44  ;;  %vm1301_vm5 = vcmp.eq.s32.totalorder %v1299_v14, 0 }
 0x1ac   : > { %vm1304_vm6 = vcmp.eq.s32.totalorder %v1299_v14, 2  ;;  %vm1300_vm7 = vcmp.lt.s32.totalorder %v1299_v14, 2 }
 0x1ad   : > { %v1284_v63 = vadd.f32 0.041655596, %v1283_v41  ;;  %v1291_v25 = vadd.f32 0.008332121, %v1290_v28  ;;  %v1408_v55 = vadd.s32 536870912, %v1407_v32 }
 0x1af   : > { %v1285_v50 = vmul.f32 %v1284_v63, %v1282_v37  ;;  %v1292_v15 = vmul.f32 %v1291_v25, %v1282_v37  ;;  %v1409_v27 = vshrl.u32 %v1408_v55, 30 }
 0x1b1   : > { %v1286_v33 = vadd.f32 -0.4999988, %v1285_v50  ;;  %v1293_v61 = vadd.f32 -0.16666654, %v1292_v15  ;;  %v1410_v4 = vshll.u32 %v1409_v27, 30  ;;  %v1433_v22 = vsub.s32 4, %v1409_v27 }
 0x1b3   : > { %v1287_v9 = vmul.f32 %v1286_v33, %v1282_v37  ;;  %v1294_v20 = vmul.f32 %v1293_v61, %v1282_v37  ;;  %v1411_v43 = vsub.s32 %v1407_v32, %v1410_v4  ;;  %v1434_v47 = vsel %vm1311_vm10, %v1433_v22, %v1409_v27 }
 0x1b4   : > { %v1436_v26 = vsel %vm1310_vm11, 0, %v1434_v47 }
 0x1b5   : > { %v1288_v46 = vadd.f32 1.0, %v1287_v9  ;;  %v1295_v48 = vadd.f32 1.0, %v1294_v20  ;;  %vm1412_vm4 = vcmp.lt.s32.totalorder %v1411_v43, 0  ;;  %v1413_v58 = vsub.s32 0, %v1411_v43 }
 0x1b6   : > { %v1453_v28 = vadd.s32 3, %v1436_v26 }
 0x1b7   : > { %v1296_v11 = vmul.f32 %v1295_v48, %v1280_v0  ;;  %v1305_v42 = vxor.u32 2147483648, %v1288_v46  ;;  %v1414_v45 = vsel %vm1412_vm4, %v1413_v58, %v1411_v43 }
 0x1b8   : > { %v1415_v8 = vclz %v1414_v45  ;;  %v1454_v25 = vand.u32 3, %v1453_v28 }
 0x1b9   : > { %v1302_v13 = vxor.u32 2147483648, %v1296_v11  ;;  %v1306_v2 = vsel %vm1304_vm6, %v1305_v42, %v1296_v11 }
 0x1ba   : > { %v1580_v12 = vadd.s32 4294967294, %v1415_v8  ;;  %vm1456_vm12 = vcmp.eq.s32.totalorder %v1454_v25, 0  ;;  %vm1459_vm13 = vcmp.eq.s32.totalorder %v1454_v25, 2  ;;  %vm1455_vm14 = vcmp.lt.s32.totalorder %v1454_v25, 2 }
 0x1bb   : > { %v1303_v29 = vsel %vm1301_vm5, %v1288_v46, %v1302_v13 }
 0x1bc   : > { %v1307_v34 = vsel %vm1300_vm7, %v1303_v29, %v1306_v2  ;;  %vm1581_vm9 = vcmp.lt.s32.totalorder %v1580_v12, 0 }
 0x1bd   : > { %v1308_v49 = vsel %vm1297_vm8, nan, %v1307_v34  ;;  %v1418_v23 = vsel %vm1581_vm9, 0, %v1580_v12 }
 0x1be   : > { %1470 = vst [vmem:[%s2108_s8 + $0x30] sm:$0xff] %v1308_v49  ;;  %v1419_v19 = vsub.s32 32, %v1418_v23  ;;  %v1423_v31 = vsub.s32 4294967266, %v1418_v23  ;;  %v1420_v60 = vshll.u32 %v1411_v43, %v1418_v23 }
 0x1c0   : > { %v1421_v62 = vshrl.u32 %v1403_v51, %v1419_v19  ;;  %v1424_v5 = vadd.s32 127, %v1423_v31 }
 0x1c2   : > { %v1422_v54 = vor.u32 %v1421_v62, %v1420_v60  ;;  %v1425_v21 = vshll.u32 %v1424_v5, 23 }
 0x1c4   : > { %v1426_v16 = vor.u32 4788187, %v1425_v21  ;;  %v1429_v3 = vcvt.s32.f32 %v1422_v54 }
 0x1c6   : > { %v1427_v57 = vand.u32 2147483647, %v1426_v16 }
 0x1c8   : > { %v1430_v56 = vmul.f32 %v1429_v3, %v1427_v57 }
 0x1ca   : > { %v1431_v39 = vxor.u32 2147483648, %v1430_v56 }
 0x1cc   : > { %v1432_v10 = vsel %vm1311_vm10, %v1431_v39, %v1430_v56 }
 0x1cd   : > { %v1435_v36 = vsel %vm1310_vm11, %v1813_v40, %v1432_v10 }
 0x1ce   : > { %v1437_v35 = vmul.f32 %v1435_v36, %v1435_v36 }
 0x1d0   : > { %v1438_v17 = vmul.f32 -0.001358992, %v1437_v35  ;;  %v1445_v0 = vmul.f32 -0.00019511016, %v1437_v35 }
 0x1d2   : > { %v1439_v52 = vadd.f32 0.041655596, %v1438_v17  ;;  %v1446_v37 = vadd.f32 0.008332121, %v1445_v0 }
 0x1d4   : > { %v1440_v30 = vmul.f32 %v1439_v52, %v1437_v35  ;;  %v1447_v6 = vmul.f32 %v1446_v37, %v1437_v35 }
 0x1d6   : > { %v1441_v38 = vadd.f32 -0.4999988, %v1440_v30  ;;  %v1448_v41 = vadd.f32 -0.16666654, %v1447_v6 }
 0x1d8   : > { %v1442_v1 = vmul.f32 %v1441_v38, %v1437_v35  ;;  %v1449_v7 = vmul.f32 %v1448_v41, %v1437_v35 }
 0x1da   : > { %v1443_v24 = vadd.f32 1.0, %v1442_v1  ;;  %v1450_v63 = vadd.f32 1.0, %v1449_v7 }
 0x1dc   : > { %v1451_v44 = vmul.f32 %v1450_v63, %v1435_v36  ;;  %v1460_v18 = vxor.u32 2147483648, %v1443_v24 }
 0x1de   : > { %v1457_v53 = vxor.u32 2147483648, %v1451_v44  ;;  %v1461_v15 = vsel %vm1459_vm13, %v1460_v18, %v1451_v44 }
 0x1e0   : > { %v1458_v50 = vsel %vm1456_vm12, %v1443_v24, %v1457_v53 }
 0x1e1   : > { %v1462_v32 = vsel %vm1455_vm14, %v1458_v50, %v1461_v15 }
 0x1e2   : > { %v1463_v33 = vsel %vm1452_vm0, nan, %v1462_v32 }
 0x1e3   : > { %1471 = vst [vmem:[%s2108_s8 + $0x38] sm:$0xff] %v1463_v33 }
 0x1e4   : > { %1667 = shalt.err (!%p1664_p3)
}
 0x1e5   : > { %s1711_s4 = smov 256   ;;  %s1712_s5 = smov 16  }
 0x1e6   : > { %1590 = dma.vmem_to_hbm [thread:$0]  (%p1771_p5), %s1487_s19, 1024, %s1489_s20, %s1473_s16, %s1711_s4, %s1711_s4, %s1712_s5  }
 0x1e7 PF: > { %p1596_p4 = scmp.ge.s32.totalorder %s1702_s15, 2  ;;  %s1503_s6 = sand.u32 1, %s1690_s12  }
 0x1e8   : > { %s1504_s7 = scalar_lea.sflag [#allocation3], %s1503_s6 }
 0x1e9   : > { %p1593_p7 = pnand %p1596_p4, %p1775_p6 }
 0x1eb   : > { %p1594_p8 = pneg %p1593_p7 }
 0x1ed   : > { %1685 = dma.done.wait (%p1594_p8), %s1504_s7, 1024  }
 0x1ee   : > { %1687 = vsyncadd (%p1594_p8), %s1504_s7, 4294966272  ;;  %p13_p9 = scmp.ge.s32.totalorder %s1758_s18, 4   ;;  %s2716_s12 = smov %s1694_s13 }
 0x1ef   : > { %s2717_s13 = smov %s1698_s14  ;;  %s2718_s14 = smov %s1769_s21 }
 0x1f0   : > { %s2719_s15 = smov %s1758_s18  ;;  %15 = sbr.rel (!%p13_p9) target bundleno = 3 (0x3), region = 67 }
 0x1f5   :  { %1510 = vsyncpa [#allocation3], 1 }
 0x1f6   :  { %1512 = vsyncpa [#allocation3 + $0x1], 1 }

</bundles_post_ra>
